<compile_context>
chip_gen: v7x
topology: tpu7x:2x2x1
jax: 0.10.0
libtpu: 0.0.40
codegen_flags: <defaults>
</compile_context>

<pallas_src>
import math
import numpy as np
import jax
import jax.numpy as jnp
from jax.experimental import pallas as pl
from jax.experimental.pallas import tpu as pltpu

_EPS = 1e-5                     # nn.BatchNorm2d default eps
_MATMUL_DTYPE = jnp.bfloat16    # conv/attention matmul operand dtype (MXU fast
                                # path); set to jnp.float32 for ~1e-4 agreement.


def _round_up(x, m):
    return ((x + m - 1) // m) * m


# ---------------------------------------------------------------------------
# host-side constant builders (plain numpy: parameter / glue setup)
# ---------------------------------------------------------------------------
def _encoder_tap_weights(w_oihw, W1, q_pad):
    """Conv3x3 weights fused with the 2x2 max-pool, per row tap, pair-row layout.

    Returns (3, 2*W1*C, 4*q_pad).  Tap t in {0: previous pair-row, 1: current,
    2: next}; the four pooling quadrants q = hr*2 + wr live side by side in the
    output lanes (each padded to q_pad lanes so the in-kernel max slices stay
    vreg-aligned).  Quadrant q's columns map GELU(BN(x1)) pair-rows to the conv
    value at (2*h2+hr, 2*w2+wr); the elementwise max over the four quadrant
    blocks is the max-pool.  Zero padding along w is baked in; padding along h
    is handled by the kernel's boundary masks."""
    Co, C, KH, KW = w_oihw.shape
    W2 = W1 // 2
    L = 2 * W1 * C
    out = np.zeros((3, L, 4 * q_pad), np.float32)
    for hr in range(2):
        for wr in range(2):
            q = hr * 2 + wr
            for kh in range(KH):
                delta = hr + kh - 1                      # input image row - 2*h2
                tap = 0 if delta < 0 else (1 if delta < 2 else 2)
                hr_in = delta % 2
                for kw in range(KW):
                    for w2 in range(W2):
                        w_in = 2 * w2 + wr + kw - 1
                        if 0 <= w_in < W1:
                            r0 = hr_in * W1 * C + w_in * C
                            c0 = q * q_pad + w2 * Co
                            out[tap, r0:r0 + C, c0:c0 + Co] += \
                                w_oihw[:, :, kh, kw].T
    return out


def _decoder_tap_weights(w_oihw, W):
    """Conv3x3 weights per row tap (3, W*C, W*Co); tap = kh (prev/cur/next)."""
    Co, C, KH, KW = w_oihw.shape
    L = W * C
    out = np.zeros((3, L, W * Co), np.float32)
    for kh in range(KH):
        for kw in range(KW):
            for w_out in range(W):
                w_in = w_out + kw - 1
                if 0 <= w_in < W:
                    out[kh, w_in * C:(w_in + 1) * C,
                        w_out * Co:(w_out + 1) * Co] += w_oihw[:, :, kh, kw].T
    return out


def _attn_weight_bcast(wa_vec, W2, C):
    """1x1 conv (Co -> 1) built directly in the broadcast W2*C lane layout."""
    Co = wa_vec.shape[0]
    out = np.zeros((W2 * Co, W2 * C), np.float32)
    for w in range(W2):
        for c in range(C):
            out[w * Co:(w + 1) * Co, w * C + c] = wa_vec
    return out


def _bn_bcast_matrix(groups, C, inv_count):
    """(groups*C, groups*C) matrix B with B[g*C+c, g'*C+c'] = inv_count*(c==c').
    A single matmul `sums @ B` turns per-lane sums into per-channel means
    broadcast back to every lane (fuses the old selector + broadcast pair;
    1/count is folded in).  Size is L^2 -- fine at these lane widths."""
    return np.tile(np.eye(C, dtype=np.float32) * inv_count, (groups, groups))


# ---------------------------------------------------------------------------
# the Pallas kernel
# ---------------------------------------------------------------------------
def _make_kernel(H2, L1, L2, L3, q_pad, attn_bias):
    mm_dtype = _MATMUL_DTYPE

    def _erf(x):
        # Abramowitz & Stegun 7.1.26 (max abs err ~1.5e-7).  lax.erf may not
        # lower on Mosaic, so keep the rational approximation.  approx=True
        # moves the reciprocal to the otherwise-idle EUP slot (~1e-4 error,
        # well inside the bf16-matmul error budget).
        p = 0.3275911
        a1, a2, a3, a4, a5 = (0.254829592, -0.284496736, 1.421413741,
                              -1.453152027, 1.061405429)
        sgn = jnp.where(x >= 0.0, 1.0, -1.0)
        ax = jnp.abs(x)
        t = pl.reciprocal(1.0 + p * ax, approx=True)
        poly = ((((a5 * t + a4) * t + a3) * t + a2) * t + a1) * t
        return sgn * (1.0 - poly * jnp.exp(-ax * ax))

    def _gelu(x):  # exact (erf) GELU == nn.GELU() default
        return 0.5 * x * (1.0 + _erf(x * 0.7071067811865476))

    def _dot(a, b):
        return jnp.dot(a, b, preferred_element_type=jnp.float32)

    def _bn_gelu(x, bcast, gbe):
        # one-pass train-mode BatchNorm2d; statistics stay in f32.
        # TODO(synk): E[x^2]-mean^2 can cancel for |mean| >> std; switch to a
        # pivot-shifted two-pass if real feature maps require it.
        sums = jnp.concatenate(
            [jnp.sum(x, axis=0, keepdims=True),
             jnp.sum(x * x, axis=0, keepdims=True)], axis=0)    # (2, L)
        lane = _dot(sums, bcast)                                # (2, L) [mean; E[x^2]]
        mean = lane[0:1, :]
        var = lane[1:2, :] - mean * mean
        inv_std = jax.lax.rsqrt(var + _EPS)
        return _gelu((x - mean) * (inv_std * gbe[0:1, :]) + gbe[1:2, :])

    def kernel(x1_ref, x2_ref, b1_ref, b2_ref, b3_ref, gbe_ref,
               we_ref, wd_ref, wab_ref, out_ref):
        x1 = x1_ref[...]                      # (NH2, L1)  pair-row layout
        x2 = x2_ref[...]                      # (NH2, L2)
        gbe = gbe_ref[...]                    # (6, Lpad)  packed gamma/beta
        nrows = x1.shape[0]

        # in-kernel image-row boundary masks (replaces the rowmask input);
        # float trick avoids vector integer div/rem and is exact here.
        rows = jax.lax.broadcasted_iota(jnp.int32, (nrows, 1), 0) \
                      .astype(jnp.float32)
        h_img = rows - jnp.floor((rows + 0.5) * (1.0 / H2)) * H2
        m_prev = (h_img > 0.5).astype(jnp.float32)        # in-image row above
        m_next = (h_img < H2 - 1.5).astype(jnp.float32)   # in-image row below

        def _taps(g):
            # +/-1 row shift with zero padding at image boundaries.  The copy
            # is only (rows, L); the old 3*L lane concat is gone (the three
            # row taps feed separate accumulating matmuls below).
            z = jnp.zeros((1, g.shape[1]), jnp.float32)
            prev = jnp.concatenate([z, g[:-1, :]], axis=0) * m_prev
            nxt = jnp.concatenate([g[1:, :], z], axis=0) * m_next
            return (prev.astype(mm_dtype), g.astype(mm_dtype),
                    nxt.astype(mm_dtype))

        def _conv3(g, w_ref):
            # three accumulating MXU dots, one per row tap (no act concat).
            p, c, n = _taps(g)
            return (_dot(c, w_ref[1]) + _dot(p, w_ref[0]) + _dot(n, w_ref[2]))

        # ---- encoder branch: BN -> GELU -> conv3x3 fused with maxpool2x2 ---
        # all four pooling quadrants come out of the same wide-N matmuls; the
        # 2x2 max is three elementwise maxes over 128-aligned lane slices.
        g1 = _bn_gelu(x1, b1_ref[...], gbe[0:2, 0:L1])
        y_enc = _conv3(g1, we_ref)                         # (NH2, 4*q_pad)
        pooled = jnp.maximum(
            jnp.maximum(y_enc[:, 0 * q_pad:0 * q_pad + L3],
                        y_enc[:, 1 * q_pad:1 * q_pad + L3]),
            jnp.maximum(y_enc[:, 2 * q_pad:2 * q_pad + L3],
                        y_enc[:, 3 * q_pad:3 * q_pad + L3]))

        # ---- decoder branch: BN -> GELU -> conv3x3 --------------------------
        g2 = _bn_gelu(x2, b2_ref[...], gbe[2:4, 0:L2])
        y_dec = _conv3(g2, wd_ref)                         # (NH2, L3)

        # conv biases b1/b2 are intentionally omitted: BN3 below subtracts the
        # per-channel batch mean of (enc + dec), which exactly cancels any
        # per-channel constant (MaxPool commutes with a constant shift).
        # NOTE: this relies on train-mode (batch-stats) BN3.
        mid = pooled + y_dec

        # ---- attention head: BN -> GELU -> conv1x1 (-> 1 ch, bcast over C) --
        g3 = _bn_gelu(mid, b3_ref[...], gbe[4:6, 0:L3])
        attn = _dot(g3.astype(mm_dtype), wab_ref[...]) + attn_bias

        out_ref[...] = attn * x2

    return kernel


# ---------------------------------------------------------------------------
# wrapper (layout transforms + parameter-derived constants + pallas_call)
# ---------------------------------------------------------------------------
def attention_block_forward(x1, x2, params):
    """x1: (N, C, 2H, 2W) encoder feature, x2: (N, C, H, W) decoder feature.
    Returns (N, C, H, W), matching AttentionBlock.forward (train-mode BN)."""
    N, C, H1, W1 = x1.shape
    _, C2, H2, W2 = x2.shape
    assert C2 == C and H1 == 2 * H2 and W1 == 2 * W2
    Co = params["w1"].shape[0]
    NH2 = N * H2
    L1 = 2 * W1 * C              # encoder pair-row lane width
    L2 = W2 * C                  # decoder / output lane width
    L3 = W2 * Co                 # conv-output lane width
    q_pad = _round_up(L3, 128)   # vreg-aligned quadrant block in the enc matmul

    # activation layouts (see TODO(synk) at top about the NCHW transposes)
    x1p = (jnp.transpose(x1, (0, 2, 3, 1))
           .reshape(N, H2, 2, W1, C)
           .reshape(NH2, L1))
    x2m = jnp.transpose(x2, (0, 2, 3, 1)).reshape(NH2, L2)

    w1 = np.asarray(params["w1"], np.float32)
    w2 = np.asarray(params["w2"], np.float32)
    wa = np.asarray(params["wa"], np.float32).reshape(Co)

    # conv weights go to the MXU in _MATMUL_DTYPE (bf16 fast path on v6e/v7x)
    we = _encoder_tap_weights(w1, W1, q_pad)             # (3, L1, 4*q_pad)
    wd = _decoder_tap_weights(w2, W2)                    # (3, L2, L3)
    wab = _attn_weight_bcast(wa, W2, C)                  # (L3, L2)

    # BatchNorm constants stay f32 (statistics path is kept in f32)
    bcast1 = _bn_bcast_matrix(2 * W1, C, 1.0 / float(N * H1 * W1))
    bcast2 = _bn_bcast_matrix(W2, C, 1.0 / float(N * H2 * W2))
    bcast3 = _bn_bcast_matrix(W2, Co, 1.0 / float(N * H2 * W2))

    lpad = max(L1, L2, L3)
    gbe = np.zeros((6, lpad), np.float32)                # packed gamma / beta
    gbe[0, :L1] = np.tile(np.asarray(params["bn1_g"], np.float32), 2 * W1)
    gbe[1, :L1] = np.tile(np.asarray(params["bn1_b"], np.float32), 2 * W1)
    gbe[2, :L2] = np.tile(np.asarray(params["bn2_g"], np.float32), W2)
    gbe[3, :L2] = np.tile(np.asarray(params["bn2_b"], np.float32), W2)
    gbe[4, :L3] = np.tile(np.asarray(params["bn3_g"], np.float32), W2)
    gbe[5, :L3] = np.tile(np.asarray(params["bn3_b"], np.float32), W2)

    args = [x1p.astype(jnp.float32), x2m.astype(jnp.float32),
            jnp.asarray(bcast1), jnp.asarray(bcast2), jnp.asarray(bcast3),
            jnp.asarray(gbe),
            jnp.asarray(we, dtype=_MATMUL_DTYPE),
            jnp.asarray(wd, dtype=_MATMUL_DTYPE),
            jnp.asarray(wab, dtype=_MATMUL_DTYPE)]

    def full_spec(a):
        zeros = (0,) * a.ndim
        return pl.BlockSpec(a.shape, lambda i, _z=zeros: _z)

    kernel = _make_kernel(H2, L1, L2, L3, q_pad,
                          float(np.asarray(params["ba"]).reshape(())))
    out_m = pl.pallas_call(
        kernel,
        out_shape=jax.ShapeDtypeStruct((NH2, L2), jnp.float32),
        grid=(1,),
        in_specs=[full_spec(a) for a in args],
        out_specs=pl.BlockSpec((NH2, L2), lambda i: (0, 0)),
        compiler_params=pltpu.CompilerParams(
            dimension_semantics=("arbitrary",),
            vmem_limit_bytes=32 * 1024 * 1024),
    )(*args)

    return jnp.transpose(out_m.reshape(N, H2, W2, C), (0, 3, 1, 2))


# ---------------------------------------------------------------------------
# pure-JAX reference (mirrors the PyTorch module) for a sanity check
# ---------------------------------------------------------------------------
def _reference_forward(x1, x2, p):
    def bn(x, g, b):
        mean = jnp.mean(x, axis=(0, 2, 3), keepdims=True)
        var = jnp.mean((x - mean) ** 2, axis=(0, 2, 3), keepdims=True)
        return ((x - mean) / jnp.sqrt(var + _EPS)
                * g[None, :, None, None] + b[None, :, None, None])

    gelu = lambda x: jax.nn.gelu(x, approximate=False)

    def conv(x, w, b, pad):
        y = jax.lax.conv_general_dilated(
            x, w, (1, 1), ((pad, pad), (pad, pad)),
            dimension_numbers=("NCHW", "OIHW", "NCHW"))
        return y + b[None, :, None, None]

    enc = conv(gelu(bn(x1, p["bn1_g"], p["bn1_b"])), p["w1"], p["b1"], 1)
    N, Co, H1, W1 = enc.shape
    enc = enc.reshape(N, Co, H1 // 2, 2, W1 // 2, 2).max(axis=(3, 5))
    dec = conv(gelu(bn(x2, p["bn2_g"], p["bn2_b"])), p["w2"], p["b2"], 1)
    out = enc + dec
    attn = conv(gelu(bn(out, p["bn3_g"], p["bn3_b"])), p["wa"], p["ba"], 0)
    return attn * x2


if __name__ == "__main__":
    key = jax.random.PRNGKey(0)
    ks = jax.random.split(key, 16)
    N, C, Co = 2, 4, 8            # input_encoder = input_decoder = 4, output_dim = 8
    H1 = W1 = 16                  # encoder feature has 2x decoder resolution
    H2, W2 = H1 // 2, W1 // 2

    params = {
        "bn1_g": 1.0 + 0.1 * jax.random.normal(ks[0], (C,), jnp.float32),
        "bn1_b": 0.1 * jax.random.normal(ks[1], (C,), jnp.float32),
        "bn2_g": 1.0 + 0.1 * jax.random.normal(ks[2], (C,), jnp.float32),
        "bn2_b": 0.1 * jax.random.normal(ks[3], (C,), jnp.float32),
        "bn3_g": 1.0 + 0.1 * jax.random.normal(ks[4], (Co,), jnp.float32),
        "bn3_b": 0.1 * jax.random.normal(ks[5], (Co,), jnp.float32),
        "w1": jax.random.normal(ks[6], (Co, C, 3, 3), jnp.float32) / math.sqrt(C * 9),
        "b1": 0.1 * jax.random.normal(ks[7], (Co,), jnp.float32),
        "w2": jax.random.normal(ks[8], (Co, C, 3, 3), jnp.float32) / math.sqrt(C * 9),
        "b2": 0.1 * jax.random.normal(ks[9], (Co,), jnp.float32),
        "wa": jax.random.normal(ks[10], (1, Co, 1, 1), jnp.float32) / math.sqrt(Co),
        "ba": 0.1 * jax.random.normal(ks[11], (1,), jnp.float32),
    }
    x1 = jax.random.normal(ks[12], (N, C, H1, W1), jnp.float32)
    x2 = jax.random.normal(ks[13], (N, C, H2, W2), jnp.float32)

    out = attention_block_forward(x1, x2, params)
    jax.block_until_ready(out)

    ref = _reference_forward(x1, x2, params)
    err = float(jnp.max(jnp.abs(out - ref)))
    rel = float(jnp.linalg.norm(out - ref) / jnp.linalg.norm(ref))
    assert out.shape == (N, C, H2, W2), out.shape
    # bf16 matmul operands (per perf review) dominate the error budget; set
    # _MATMUL_DTYPE = jnp.float32 for ~1e-4 agreement with the f32 reference.
    if _MATMUL_DTYPE == jnp.bfloat16:
        tol_abs, tol_rel = 5e-2, 2e-2
    else:
        tol_abs, tol_rel = 1e-3, 1e-3
    assert err < tol_abs and rel < tol_rel, (err, rel)
    print("KERNEL_OK")
</pallas_src>

<mosaic_0001>
module attributes {stable_mosaic.version = 11 : i64} {
  func.func @kernel(%arg0: i32, %arg1: memref<16x128xf32, #tpu.memory_space<vmem>>, %arg2: memref<16x32xf32, #tpu.memory_space<vmem>>, %arg3: memref<128x128xf32, #tpu.memory_space<vmem>>, %arg4: memref<32x32xf32, #tpu.memory_space<vmem>>, %arg5: memref<64x64xf32, #tpu.memory_space<vmem>>, %arg6: memref<6x128xf32, #tpu.memory_space<vmem>>, %arg7: memref<3x128x512xbf16, #tpu.memory_space<vmem>>, %arg8: memref<3x32x64xbf16, #tpu.memory_space<vmem>>, %arg9: memref<64x32xbf16, #tpu.memory_space<vmem>>, %arg10: memref<16x32xf32, #tpu.memory_space<vmem>>) attributes {dimension_semantics = [#tpu.dimension_semantics<arbitrary>], iteration_bounds = array<i64: 1>, scalar_prefetch = 0 : i64, scratch_operands = 0 : i64, tpu.core_type = #tpu.core_type<tc>, window_params = [{pipeline_mode = #tpu.pipeline_mode<synchronous>, transform_indices = @transform_0, window_bounds = array<i64: 16, 128>}, {pipeline_mode = #tpu.pipeline_mode<synchronous>, transform_indices = @transform_1, window_bounds = array<i64: 16, 32>}, {pipeline_mode = #tpu.pipeline_mode<synchronous>, transform_indices = @transform_2, window_bounds = array<i64: 128, 128>}, {pipeline_mode = #tpu.pipeline_mode<synchronous>, transform_indices = @transform_3, window_bounds = array<i64: 32, 32>}, {pipeline_mode = #tpu.pipeline_mode<synchronous>, transform_indices = @transform_4, window_bounds = array<i64: 64, 64>}, {pipeline_mode = #tpu.pipeline_mode<synchronous>, transform_indices = @transform_5, window_bounds = array<i64: 6, 128>}, {pipeline_mode = #tpu.pipeline_mode<synchronous>, transform_indices = @transform_6, window_bounds = array<i64: 3, 128, 512>}, {pipeline_mode = #tpu.pipeline_mode<synchronous>, transform_indices = @transform_7, window_bounds = array<i64: 3, 32, 64>}, {pipeline_mode = #tpu.pipeline_mode<synchronous>, transform_indices = @transform_8, window_bounds = array<i64: 64, 32>}, {pipeline_mode = #tpu.pipeline_mode<synchronous>, transform_indices = @transform_9, window_bounds = array<i64: 16, 32>}]} {
    %c0 = arith.constant 0 : index
    %c0_0 = arith.constant 0 : index
    %0 = vector.load %arg1[%c0, %c0_0] : memref<16x128xf32, #tpu.memory_space<vmem>>, vector<16x128xf32>
    %c0_1 = arith.constant 0 : index
    %c0_2 = arith.constant 0 : index
    %1 = vector.load %arg2[%c0_1, %c0_2] : memref<16x32xf32, #tpu.memory_space<vmem>>, vector<16x32xf32>
    %c0_3 = arith.constant 0 : index
    %c0_4 = arith.constant 0 : index
    %2 = vector.load %arg6[%c0_3, %c0_4] : memref<6x128xf32, #tpu.memory_space<vmem>>, vector<6x128xf32>
    %3 = tpu.iota {dimensions = array<i32: 0>} : vector<16x1xi32>
    %4 = arith.sitofp %3 : vector<16x1xi32> to vector<16x1xf32>
    %cst = arith.constant 5.000000e-01 : f32
    %5 = vector.broadcast %cst : f32 to vector<16x1xf32>
    %6 = arith.addf %4, %5 : vector<16x1xf32>
    %cst_5 = arith.constant 1.250000e-01 : f32
    %7 = vector.broadcast %cst_5 : f32 to vector<16x1xf32>
    %8 = arith.mulf %6, %7 : vector<16x1xf32>
    %9 = math.floor %8 : vector<16x1xf32>
    %cst_6 = arith.constant 8.000000e+00 : f32
    %10 = vector.broadcast %cst_6 : f32 to vector<16x1xf32>
    %11 = arith.mulf %9, %10 : vector<16x1xf32>
    %12 = arith.subf %4, %11 : vector<16x1xf32>
    %cst_7 = arith.constant 5.000000e-01 : f32
    %13 = vector.broadcast %cst_7 : f32 to vector<16x1xf32>
    %14 = arith.cmpf ogt, %12, %13 : vector<16x1xf32>
    %15 = arith.extui %14 : vector<16x1xi1> to vector<16x1xi32>
    %16 = arith.sitofp %15 : vector<16x1xi32> to vector<16x1xf32>
    %cst_8 = arith.constant 6.500000e+00 : f32
    %17 = vector.broadcast %cst_8 : f32 to vector<16x1xf32>
    %18 = arith.cmpf olt, %12, %17 : vector<16x1xf32>
    %19 = arith.extui %18 : vector<16x1xi1> to vector<16x1xi32>
    %20 = arith.sitofp %19 : vector<16x1xi32> to vector<16x1xf32>
    %c0_9 = arith.constant 0 : index
    %c0_10 = arith.constant 0 : index
    %21 = vector.load %arg3[%c0_9, %c0_10] : memref<128x128xf32, #tpu.memory_space<vmem>>, vector<128x128xf32>
    %22 = vector.extract_strided_slice %2 {offsets = [0, 0], sizes = [2, 128], strides = [1, 1]} : vector<6x128xf32> to vector<2x128xf32>
    %cst_11 = arith.constant dense<0.000000e+00> : vector<128xf32>
    %23 = vector.multi_reduction <add>, %0, %cst_11 [0] : vector<16x128xf32> to vector<128xf32>
    %24 = vector.shape_cast %23 : vector<128xf32> to vector<1x128xf32>
    %25 = arith.mulf %0, %0 : vector<16x128xf32>
    %cst_12 = arith.constant dense<0.000000e+00> : vector<128xf32>
    %26 = vector.multi_reduction <add>, %25, %cst_12 [0] : vector<16x128xf32> to vector<128xf32>
    %27 = vector.shape_cast %26 : vector<128xf32> to vector<1x128xf32>
    %28 = tpu.concatenate %24, %27 in 0 : vector<1x128xf32>, vector<1x128xf32> -> vector<2x128xf32>
    %cst_13 = arith.constant dense<0.000000e+00> : vector<2x128xf32>
    %29 = tpu.matmul %28, %21, %cst_13 {dimension_numbers = #tpu.dot_dimension_numbers<[1], [0], [0], [1], [0, 0, 1, 1], [], []>} : vector<2x128xf32>, vector<128x128xf32>, vector<2x128xf32> -> vector<2x128xf32>
    %30 = vector.extract_strided_slice %29 {offsets = [0, 0], sizes = [1, 128], strides = [1, 1]} : vector<2x128xf32> to vector<1x128xf32>
    %31 = vector.extract_strided_slice %29 {offsets = [1, 0], sizes = [1, 128], strides = [1, 1]} : vector<2x128xf32> to vector<1x128xf32>
    %32 = arith.mulf %30, %30 : vector<1x128xf32>
    %33 = arith.subf %31, %32 : vector<1x128xf32>
    %cst_14 = arith.constant 9.99999974E-6 : f32
    %34 = vector.broadcast %cst_14 : f32 to vector<1x128xf32>
    %35 = arith.addf %33, %34 : vector<1x128xf32>
    %36 = math.rsqrt %35 : vector<1x128xf32>
    %37 = vector.broadcast %30 : vector<1x128xf32> to vector<16x128xf32>
    %38 = arith.subf %0, %37 : vector<16x128xf32>
    %39 = vector.extract_strided_slice %22 {offsets = [0, 0], sizes = [1, 128], strides = [1, 1]} : vector<2x128xf32> to vector<1x128xf32>
    %40 = arith.mulf %36, %39 : vector<1x128xf32>
    %41 = vector.broadcast %40 : vector<1x128xf32> to vector<16x128xf32>
    %42 = arith.mulf %38, %41 : vector<16x128xf32>
    %43 = vector.extract_strided_slice %22 {offsets = [1, 0], sizes = [1, 128], strides = [1, 1]} : vector<2x128xf32> to vector<1x128xf32>
    %44 = vector.broadcast %43 : vector<1x128xf32> to vector<16x128xf32>
    %45 = arith.addf %42, %44 : vector<16x128xf32>
    %cst_15 = arith.constant 5.000000e-01 : f32
    %46 = vector.broadcast %cst_15 : f32 to vector<16x128xf32>
    %47 = arith.mulf %46, %45 : vector<16x128xf32>
    %cst_16 = arith.constant 0.707106769 : f32
    %48 = vector.broadcast %cst_16 : f32 to vector<16x128xf32>
    %49 = arith.mulf %45, %48 : vector<16x128xf32>
    %cst_17 = arith.constant 0.000000e+00 : f32
    %50 = vector.broadcast %cst_17 : f32 to vector<16x128xf32>
    %51 = arith.cmpf oge, %49, %50 : vector<16x128xf32>
    %cst_18 = arith.constant 1.000000e+00 : f32
    %cst_19 = arith.constant -1.000000e+00 : f32
    %52 = vector.broadcast %cst_18 : f32 to vector<16x128xf32>
    %53 = vector.broadcast %cst_19 : f32 to vector<16x128xf32>
    %54 = arith.select %51, %52, %53 : vector<16x128xi1>, vector<16x128xf32>
    %55 = math.absf %49 : vector<16x128xf32>
    %cst_20 = arith.constant 0.327591091 : f32
    %56 = vector.broadcast %cst_20 : f32 to vector<16x128xf32>
    %57 = arith.mulf %56, %55 : vector<16x128xf32>
    %cst_21 = arith.constant 1.000000e+00 : f32
    %58 = vector.broadcast %cst_21 : f32 to vector<16x128xf32>
    %59 = arith.addf %58, %57 : vector<16x128xf32>
    %60 = tpu.reciprocal %59 {approx = true} : vector<16x128xf32> -> vector<16x128xf32>
    %cst_22 = arith.constant 1.06140542 : f32
    %61 = vector.broadcast %cst_22 : f32 to vector<16x128xf32>
    %62 = arith.mulf %61, %60 : vector<16x128xf32>
    %cst_23 = arith.constant -1.45315206 : f32
    %63 = vector.broadcast %cst_23 : f32 to vector<16x128xf32>
    %64 = arith.addf %62, %63 : vector<16x128xf32>
    %65 = arith.mulf %64, %60 : vector<16x128xf32>
    %cst_24 = arith.constant 1.42141378 : f32
    %66 = vector.broadcast %cst_24 : f32 to vector<16x128xf32>
    %67 = arith.addf %65, %66 : vector<16x128xf32>
    %68 = arith.mulf %67, %60 : vector<16x128xf32>
    %cst_25 = arith.constant -0.284496725 : f32
    %69 = vector.broadcast %cst_25 : f32 to vector<16x128xf32>
    %70 = arith.addf %68, %69 : vector<16x128xf32>
    %71 = arith.mulf %70, %60 : vector<16x128xf32>
    %cst_26 = arith.constant 0.254829586 : f32
    %72 = vector.broadcast %cst_26 : f32 to vector<16x128xf32>
    %73 = arith.addf %71, %72 : vector<16x128xf32>
    %74 = arith.mulf %73, %60 : vector<16x128xf32>
    %cst_27 = arith.constant 0.000000e+00 : f32
    %75 = vector.broadcast %cst_27 : f32 to vector<16x128xf32>
    %76 = arith.subf %75, %55 : vector<16x128xf32>
    %77 = arith.mulf %76, %55 : vector<16x128xf32>
    %78 = math.exp %77 : vector<16x128xf32>
    %79 = arith.mulf %74, %78 : vector<16x128xf32>
    %cst_28 = arith.constant 1.000000e+00 : f32
    %80 = vector.broadcast %cst_28 : f32 to vector<16x128xf32>
    %81 = arith.subf %80, %79 : vector<16x128xf32>
    %82 = arith.mulf %54, %81 : vector<16x128xf32>
    %cst_29 = arith.constant 1.000000e+00 : f32
    %83 = vector.broadcast %cst_29 : f32 to vector<16x128xf32>
    %84 = arith.addf %83, %82 : vector<16x128xf32>
    %85 = arith.mulf %47, %84 : vector<16x128xf32>
    %cst_30 = arith.constant 0.000000e+00 : f32
    %86 = vector.broadcast %cst_30 : f32 to vector<1x128xf32>
    %87 = vector.extract_strided_slice %85 {offsets = [0, 0], sizes = [15, 128], strides = [1, 1]} : vector<16x128xf32> to vector<15x128xf32>
    %88 = tpu.concatenate %86, %87 in 0 : vector<1x128xf32>, vector<15x128xf32> -> vector<16x128xf32>
    %89 = vector.broadcast %16 : vector<16x1xf32> to vector<16x128xf32>
    %90 = arith.mulf %88, %89 : vector<16x128xf32>
    %91 = vector.extract_strided_slice %85 {offsets = [1, 0], sizes = [15, 128], strides = [1, 1]} : vector<16x128xf32> to vector<15x128xf32>
    %92 = tpu.concatenate %91, %86 in 0 : vector<15x128xf32>, vector<1x128xf32> -> vector<16x128xf32>
    %93 = vector.broadcast %20 : vector<16x1xf32> to vector<16x128xf32>
    %94 = arith.mulf %92, %93 : vector<16x128xf32>
    %95 = arith.truncf %90 : vector<16x128xf32> to vector<16x128xbf16>
    %96 = arith.truncf %85 : vector<16x128xf32> to vector<16x128xbf16>
    %97 = arith.truncf %94 : vector<16x128xf32> to vector<16x128xbf16>
    %c1 = arith.constant 1 : index
    %c0_31 = arith.constant 0 : index
    %c0_32 = arith.constant 0 : index
    %98 = vector.load %arg7[%c1, %c0_31, %c0_32] : memref<3x128x512xbf16, #tpu.memory_space<vmem>>, vector<1x128x512xbf16>
    %99 = vector.shape_cast %98 : vector<1x128x512xbf16> to vector<128x512xbf16>
    %cst_33 = arith.constant dense<0.000000e+00> : vector<16x512xf32>
    %100 = tpu.matmul %96, %99, %cst_33 {dimension_numbers = #tpu.dot_dimension_numbers<[1], [0], [0], [1], [0, 0, 1, 1], [], []>} : vector<16x128xbf16>, vector<128x512xbf16>, vector<16x512xf32> -> vector<16x512xf32>
    %c0_34 = arith.constant 0 : index
    %c0_35 = arith.constant 0 : index
    %c0_36 = arith.constant 0 : index
    %101 = vector.load %arg7[%c0_34, %c0_35, %c0_36] : memref<3x128x512xbf16, #tpu.memory_space<vmem>>, vector<1x128x512xbf16>
    %102 = vector.shape_cast %101 : vector<1x128x512xbf16> to vector<128x512xbf16>
    %cst_37 = arith.constant dense<0.000000e+00> : vector<16x512xf32>
    %103 = tpu.matmul %95, %102, %cst_37 {dimension_numbers = #tpu.dot_dimension_numbers<[1], [0], [0], [1], [0, 0, 1, 1], [], []>} : vector<16x128xbf16>, vector<128x512xbf16>, vector<16x512xf32> -> vector<16x512xf32>
    %104 = arith.addf %100, %103 : vector<16x512xf32>
    %c2 = arith.constant 2 : index
    %c0_38 = arith.constant 0 : index
    %c0_39 = arith.constant 0 : index
    %105 = vector.load %arg7[%c2, %c0_38, %c0_39] : memref<3x128x512xbf16, #tpu.memory_space<vmem>>, vector<1x128x512xbf16>
    %106 = vector.shape_cast %105 : vector<1x128x512xbf16> to vector<128x512xbf16>
    %cst_40 = arith.constant dense<0.000000e+00> : vector<16x512xf32>
    %107 = tpu.matmul %97, %106, %cst_40 {dimension_numbers = #tpu.dot_dimension_numbers<[1], [0], [0], [1], [0, 0, 1, 1], [], []>} : vector<16x128xbf16>, vector<128x512xbf16>, vector<16x512xf32> -> vector<16x512xf32>
    %108 = arith.addf %104, %107 : vector<16x512xf32>
    %109 = vector.extract_strided_slice %108 {offsets = [0, 0], sizes = [16, 64], strides = [1, 1]} : vector<16x512xf32> to vector<16x64xf32>
    %110 = vector.extract_strided_slice %108 {offsets = [0, 128], sizes = [16, 64], strides = [1, 1]} : vector<16x512xf32> to vector<16x64xf32>
    %111 = arith.maximumf %109, %110 : vector<16x64xf32>
    %112 = vector.extract_strided_slice %108 {offsets = [0, 256], sizes = [16, 64], strides = [1, 1]} : vector<16x512xf32> to vector<16x64xf32>
    %113 = vector.extract_strided_slice %108 {offsets = [0, 384], sizes = [16, 64], strides = [1, 1]} : vector<16x512xf32> to vector<16x64xf32>
    %114 = arith.maximumf %112, %113 : vector<16x64xf32>
    %115 = arith.maximumf %111, %114 : vector<16x64xf32>
    %c0_41 = arith.constant 0 : index
    %c0_42 = arith.constant 0 : index
    %116 = vector.load %arg4[%c0_41, %c0_42] : memref<32x32xf32, #tpu.memory_space<vmem>>, vector<32x32xf32>
    %117 = vector.extract_strided_slice %2 {offsets = [2, 0], sizes = [2, 32], strides = [1, 1]} : vector<6x128xf32> to vector<2x32xf32>
    %cst_43 = arith.constant dense<0.000000e+00> : vector<32xf32>
    %118 = vector.multi_reduction <add>, %1, %cst_43 [0] : vector<16x32xf32> to vector<32xf32>
    %119 = vector.shape_cast %118 : vector<32xf32> to vector<1x32xf32>
    %120 = arith.mulf %1, %1 : vector<16x32xf32>
    %cst_44 = arith.constant dense<0.000000e+00> : vector<32xf32>
    %121 = vector.multi_reduction <add>, %120, %cst_44 [0] : vector<16x32xf32> to vector<32xf32>
    %122 = vector.shape_cast %121 : vector<32xf32> to vector<1x32xf32>
    %123 = tpu.concatenate %119, %122 in 0 : vector<1x32xf32>, vector<1x32xf32> -> vector<2x32xf32>
    %cst_45 = arith.constant dense<0.000000e+00> : vector<2x32xf32>
    %124 = tpu.matmul %123, %116, %cst_45 {dimension_numbers = #tpu.dot_dimension_numbers<[1], [0], [0], [1], [0, 0, 1, 1], [], []>} : vector<2x32xf32>, vector<32x32xf32>, vector<2x32xf32> -> vector<2x32xf32>
    %125 = vector.extract_strided_slice %124 {offsets = [0, 0], sizes = [1, 32], strides = [1, 1]} : vector<2x32xf32> to vector<1x32xf32>
    %126 = vector.extract_strided_slice %124 {offsets = [1, 0], sizes = [1, 32], strides = [1, 1]} : vector<2x32xf32> to vector<1x32xf32>
    %127 = arith.mulf %125, %125 : vector<1x32xf32>
    %128 = arith.subf %126, %127 : vector<1x32xf32>
    %cst_46 = arith.constant 9.99999974E-6 : f32
    %129 = vector.broadcast %cst_46 : f32 to vector<1x32xf32>
    %130 = arith.addf %128, %129 : vector<1x32xf32>
    %131 = math.rsqrt %130 : vector<1x32xf32>
    %132 = vector.broadcast %125 : vector<1x32xf32> to vector<16x32xf32>
    %133 = arith.subf %1, %132 : vector<16x32xf32>
    %134 = vector.extract_strided_slice %117 {offsets = [0, 0], sizes = [1, 32], strides = [1, 1]} : vector<2x32xf32> to vector<1x32xf32>
    %135 = arith.mulf %131, %134 : vector<1x32xf32>
    %136 = vector.broadcast %135 : vector<1x32xf32> to vector<16x32xf32>
    %137 = arith.mulf %133, %136 : vector<16x32xf32>
    %138 = vector.extract_strided_slice %117 {offsets = [1, 0], sizes = [1, 32], strides = [1, 1]} : vector<2x32xf32> to vector<1x32xf32>
    %139 = vector.broadcast %138 : vector<1x32xf32> to vector<16x32xf32>
    %140 = arith.addf %137, %139 : vector<16x32xf32>
    %cst_47 = arith.constant 5.000000e-01 : f32
    %141 = vector.broadcast %cst_47 : f32 to vector<16x32xf32>
    %142 = arith.mulf %141, %140 : vector<16x32xf32>
    %cst_48 = arith.constant 0.707106769 : f32
    %143 = vector.broadcast %cst_48 : f32 to vector<16x32xf32>
    %144 = arith.mulf %140, %143 : vector<16x32xf32>
    %cst_49 = arith.constant 0.000000e+00 : f32
    %145 = vector.broadcast %cst_49 : f32 to vector<16x32xf32>
    %146 = arith.cmpf oge, %144, %145 : vector<16x32xf32>
    %cst_50 = arith.constant 1.000000e+00 : f32
    %cst_51 = arith.constant -1.000000e+00 : f32
    %147 = vector.broadcast %cst_50 : f32 to vector<16x32xf32>
    %148 = vector.broadcast %cst_51 : f32 to vector<16x32xf32>
    %149 = arith.select %146, %147, %148 : vector<16x32xi1>, vector<16x32xf32>
    %150 = math.absf %144 : vector<16x32xf32>
    %cst_52 = arith.constant 0.327591091 : f32
    %151 = vector.broadcast %cst_52 : f32 to vector<16x32xf32>
    %152 = arith.mulf %151, %150 : vector<16x32xf32>
    %cst_53 = arith.constant 1.000000e+00 : f32
    %153 = vector.broadcast %cst_53 : f32 to vector<16x32xf32>
    %154 = arith.addf %153, %152 : vector<16x32xf32>
    %155 = tpu.reciprocal %154 {approx = true} : vector<16x32xf32> -> vector<16x32xf32>
    %cst_54 = arith.constant 1.06140542 : f32
    %156 = vector.broadcast %cst_54 : f32 to vector<16x32xf32>
    %157 = arith.mulf %156, %155 : vector<16x32xf32>
    %cst_55 = arith.constant -1.45315206 : f32
    %158 = vector.broadcast %cst_55 : f32 to vector<16x32xf32>
    %159 = arith.addf %157, %158 : vector<16x32xf32>
    %160 = arith.mulf %159, %155 : vector<16x32xf32>
    %cst_56 = arith.constant 1.42141378 : f32
    %161 = vector.broadcast %cst_56 : f32 to vector<16x32xf32>
    %162 = arith.addf %160, %161 : vector<16x32xf32>
    %163 = arith.mulf %162, %155 : vector<16x32xf32>
    %cst_57 = arith.constant -0.284496725 : f32
    %164 = vector.broadcast %cst_57 : f32 to vector<16x32xf32>
    %165 = arith.addf %163, %164 : vector<16x32xf32>
    %166 = arith.mulf %165, %155 : vector<16x32xf32>
    %cst_58 = arith.constant 0.254829586 : f32
    %167 = vector.broadcast %cst_58 : f32 to vector<16x32xf32>
    %168 = arith.addf %166, %167 : vector<16x32xf32>
    %169 = arith.mulf %168, %155 : vector<16x32xf32>
    %cst_59 = arith.constant 0.000000e+00 : f32
    %170 = vector.broadcast %cst_59 : f32 to vector<16x32xf32>
    %171 = arith.subf %170, %150 : vector<16x32xf32>
    %172 = arith.mulf %171, %150 : vector<16x32xf32>
    %173 = math.exp %172 : vector<16x32xf32>
    %174 = arith.mulf %169, %173 : vector<16x32xf32>
    %cst_60 = arith.constant 1.000000e+00 : f32
    %175 = vector.broadcast %cst_60 : f32 to vector<16x32xf32>
    %176 = arith.subf %175, %174 : vector<16x32xf32>
    %177 = arith.mulf %149, %176 : vector<16x32xf32>
    %cst_61 = arith.constant 1.000000e+00 : f32
    %178 = vector.broadcast %cst_61 : f32 to vector<16x32xf32>
    %179 = arith.addf %178, %177 : vector<16x32xf32>
    %180 = arith.mulf %142, %179 : vector<16x32xf32>
    %cst_62 = arith.constant 0.000000e+00 : f32
    %181 = vector.broadcast %cst_62 : f32 to vector<1x32xf32>
    %182 = vector.extract_strided_slice %180 {offsets = [0, 0], sizes = [15, 32], strides = [1, 1]} : vector<16x32xf32> to vector<15x32xf32>
    %183 = tpu.concatenate %181, %182 in 0 : vector<1x32xf32>, vector<15x32xf32> -> vector<16x32xf32>
    %184 = vector.broadcast %16 : vector<16x1xf32> to vector<16x32xf32>
    %185 = arith.mulf %183, %184 : vector<16x32xf32>
    %186 = vector.extract_strided_slice %180 {offsets = [1, 0], sizes = [15, 32], strides = [1, 1]} : vector<16x32xf32> to vector<15x32xf32>
    %187 = tpu.concatenate %186, %181 in 0 : vector<15x32xf32>, vector<1x32xf32> -> vector<16x32xf32>
    %188 = vector.broadcast %20 : vector<16x1xf32> to vector<16x32xf32>
    %189 = arith.mulf %187, %188 : vector<16x32xf32>
    %190 = arith.truncf %185 : vector<16x32xf32> to vector<16x32xbf16>
    %191 = arith.truncf %180 : vector<16x32xf32> to vector<16x32xbf16>
    %192 = arith.truncf %189 : vector<16x32xf32> to vector<16x32xbf16>
    %c1_63 = arith.constant 1 : index
    %c0_64 = arith.constant 0 : index
    %c0_65 = arith.constant 0 : index
    %193 = vector.load %arg8[%c1_63, %c0_64, %c0_65] : memref<3x32x64xbf16, #tpu.memory_space<vmem>>, vector<1x32x64xbf16>
    %194 = vector.shape_cast %193 : vector<1x32x64xbf16> to vector<32x64xbf16>
    %cst_66 = arith.constant dense<0.000000e+00> : vector<16x64xf32>
    %195 = tpu.matmul %191, %194, %cst_66 {dimension_numbers = #tpu.dot_dimension_numbers<[1], [0], [0], [1], [0, 0, 1, 1], [], []>} : vector<16x32xbf16>, vector<32x64xbf16>, vector<16x64xf32> -> vector<16x64xf32>
    %c0_67 = arith.constant 0 : index
    %c0_68 = arith.constant 0 : index
    %c0_69 = arith.constant 0 : index
    %196 = vector.load %arg8[%c0_67, %c0_68, %c0_69] : memref<3x32x64xbf16, #tpu.memory_space<vmem>>, vector<1x32x64xbf16>
    %197 = vector.shape_cast %196 : vector<1x32x64xbf16> to vector<32x64xbf16>
    %cst_70 = arith.constant dense<0.000000e+00> : vector<16x64xf32>
    %198 = tpu.matmul %190, %197, %cst_70 {dimension_numbers = #tpu.dot_dimension_numbers<[1], [0], [0], [1], [0, 0, 1, 1], [], []>} : vector<16x32xbf16>, vector<32x64xbf16>, vector<16x64xf32> -> vector<16x64xf32>
    %199 = arith.addf %195, %198 : vector<16x64xf32>
    %c2_71 = arith.constant 2 : index
    %c0_72 = arith.constant 0 : index
    %c0_73 = arith.constant 0 : index
    %200 = vector.load %arg8[%c2_71, %c0_72, %c0_73] : memref<3x32x64xbf16, #tpu.memory_space<vmem>>, vector<1x32x64xbf16>
    %201 = vector.shape_cast %200 : vector<1x32x64xbf16> to vector<32x64xbf16>
    %cst_74 = arith.constant dense<0.000000e+00> : vector<16x64xf32>
    %202 = tpu.matmul %192, %201, %cst_74 {dimension_numbers = #tpu.dot_dimension_numbers<[1], [0], [0], [1], [0, 0, 1, 1], [], []>} : vector<16x32xbf16>, vector<32x64xbf16>, vector<16x64xf32> -> vector<16x64xf32>
    %203 = arith.addf %199, %202 : vector<16x64xf32>
    %204 = arith.addf %115, %203 : vector<16x64xf32>
    %c0_75 = arith.constant 0 : index
    %c0_76 = arith.constant 0 : index
    %205 = vector.load %arg5[%c0_75, %c0_76] : memref<64x64xf32, #tpu.memory_space<vmem>>, vector<64x64xf32>
    %206 = vector.extract_strided_slice %2 {offsets = [4, 0], sizes = [2, 64], strides = [1, 1]} : vector<6x128xf32> to vector<2x64xf32>
    %cst_77 = arith.constant dense<0.000000e+00> : vector<64xf32>
    %207 = vector.multi_reduction <add>, %204, %cst_77 [0] : vector<16x64xf32> to vector<64xf32>
    %208 = vector.shape_cast %207 : vector<64xf32> to vector<1x64xf32>
    %209 = arith.mulf %204, %204 : vector<16x64xf32>
    %cst_78 = arith.constant dense<0.000000e+00> : vector<64xf32>
    %210 = vector.multi_reduction <add>, %209, %cst_78 [0] : vector<16x64xf32> to vector<64xf32>
    %211 = vector.shape_cast %210 : vector<64xf32> to vector<1x64xf32>
    %212 = tpu.concatenate %208, %211 in 0 : vector<1x64xf32>, vector<1x64xf32> -> vector<2x64xf32>
    %cst_79 = arith.constant dense<0.000000e+00> : vector<2x64xf32>
    %213 = tpu.matmul %212, %205, %cst_79 {dimension_numbers = #tpu.dot_dimension_numbers<[1], [0], [0], [1], [0, 0, 1, 1], [], []>} : vector<2x64xf32>, vector<64x64xf32>, vector<2x64xf32> -> vector<2x64xf32>
    %214 = vector.extract_strided_slice %213 {offsets = [0, 0], sizes = [1, 64], strides = [1, 1]} : vector<2x64xf32> to vector<1x64xf32>
    %215 = vector.extract_strided_slice %213 {offsets = [1, 0], sizes = [1, 64], strides = [1, 1]} : vector<2x64xf32> to vector<1x64xf32>
    %216 = arith.mulf %214, %214 : vector<1x64xf32>
    %217 = arith.subf %215, %216 : vector<1x64xf32>
    %cst_80 = arith.constant 9.99999974E-6 : f32
    %218 = vector.broadcast %cst_80 : f32 to vector<1x64xf32>
    %219 = arith.addf %217, %218 : vector<1x64xf32>
    %220 = math.rsqrt %219 : vector<1x64xf32>
    %221 = vector.broadcast %214 : vector<1x64xf32> to vector<16x64xf32>
    %222 = arith.subf %204, %221 : vector<16x64xf32>
    %223 = vector.extract_strided_slice %206 {offsets = [0, 0], sizes = [1, 64], strides = [1, 1]} : vector<2x64xf32> to vector<1x64xf32>
    %224 = arith.mulf %220, %223 : vector<1x64xf32>
    %225 = vector.broadcast %224 : vector<1x64xf32> to vector<16x64xf32>
    %226 = arith.mulf %222, %225 : vector<16x64xf32>
    %227 = vector.extract_strided_slice %206 {offsets = [1, 0], sizes = [1, 64], strides = [1, 1]} : vector<2x64xf32> to vector<1x64xf32>
    %228 = vector.broadcast %227 : vector<1x64xf32> to vector<16x64xf32>
    %229 = arith.addf %226, %228 : vector<16x64xf32>
    %cst_81 = arith.constant 5.000000e-01 : f32
    %230 = vector.broadcast %cst_81 : f32 to vector<16x64xf32>
    %231 = arith.mulf %230, %229 : vector<16x64xf32>
    %cst_82 = arith.constant 0.707106769 : f32
    %232 = vector.broadcast %cst_82 : f32 to vector<16x64xf32>
    %233 = arith.mulf %229, %232 : vector<16x64xf32>
    %cst_83 = arith.constant 0.000000e+00 : f32
    %234 = vector.broadcast %cst_83 : f32 to vector<16x64xf32>
    %235 = arith.cmpf oge, %233, %234 : vector<16x64xf32>
    %cst_84 = arith.constant 1.000000e+00 : f32
    %cst_85 = arith.constant -1.000000e+00 : f32
    %236 = vector.broadcast %cst_84 : f32 to vector<16x64xf32>
    %237 = vector.broadcast %cst_85 : f32 to vector<16x64xf32>
    %238 = arith.select %235, %236, %237 : vector<16x64xi1>, vector<16x64xf32>
    %239 = math.absf %233 : vector<16x64xf32>
    %cst_86 = arith.constant 0.327591091 : f32
    %240 = vector.broadcast %cst_86 : f32 to vector<16x64xf32>
    %241 = arith.mulf %240, %239 : vector<16x64xf32>
    %cst_87 = arith.constant 1.000000e+00 : f32
    %242 = vector.broadcast %cst_87 : f32 to vector<16x64xf32>
    %243 = arith.addf %242, %241 : vector<16x64xf32>
    %244 = tpu.reciprocal %243 {approx = true} : vector<16x64xf32> -> vector<16x64xf32>
    %cst_88 = arith.constant 1.06140542 : f32
    %245 = vector.broadcast %cst_88 : f32 to vector<16x64xf32>
    %246 = arith.mulf %245, %244 : vector<16x64xf32>
    %cst_89 = arith.constant -1.45315206 : f32
    %247 = vector.broadcast %cst_89 : f32 to vector<16x64xf32>
    %248 = arith.addf %246, %247 : vector<16x64xf32>
    %249 = arith.mulf %248, %244 : vector<16x64xf32>
    %cst_90 = arith.constant 1.42141378 : f32
    %250 = vector.broadcast %cst_90 : f32 to vector<16x64xf32>
    %251 = arith.addf %249, %250 : vector<16x64xf32>
    %252 = arith.mulf %251, %244 : vector<16x64xf32>
    %cst_91 = arith.constant -0.284496725 : f32
    %253 = vector.broadcast %cst_91 : f32 to vector<16x64xf32>
    %254 = arith.addf %252, %253 : vector<16x64xf32>
    %255 = arith.mulf %254, %244 : vector<16x64xf32>
    %cst_92 = arith.constant 0.254829586 : f32
    %256 = vector.broadcast %cst_92 : f32 to vector<16x64xf32>
    %257 = arith.addf %255, %256 : vector<16x64xf32>
    %258 = arith.mulf %257, %244 : vector<16x64xf32>
    %cst_93 = arith.constant 0.000000e+00 : f32
    %259 = vector.broadcast %cst_93 : f32 to vector<16x64xf32>
    %260 = arith.subf %259, %239 : vector<16x64xf32>
    %261 = arith.mulf %260, %239 : vector<16x64xf32>
    %262 = math.exp %261 : vector<16x64xf32>
    %263 = arith.mulf %258, %262 : vector<16x64xf32>
    %cst_94 = arith.constant 1.000000e+00 : f32
    %264 = vector.broadcast %cst_94 : f32 to vector<16x64xf32>
    %265 = arith.subf %264, %263 : vector<16x64xf32>
    %266 = arith.mulf %238, %265 : vector<16x64xf32>
    %cst_95 = arith.constant 1.000000e+00 : f32
    %267 = vector.broadcast %cst_95 : f32 to vector<16x64xf32>
    %268 = arith.addf %267, %266 : vector<16x64xf32>
    %269 = arith.mulf %231, %268 : vector<16x64xf32>
    %270 = arith.truncf %269 : vector<16x64xf32> to vector<16x64xbf16>
    %c0_96 = arith.constant 0 : index
    %c0_97 = arith.constant 0 : index
    %271 = vector.load %arg9[%c0_96, %c0_97] : memref<64x32xbf16, #tpu.memory_space<vmem>>, vector<64x32xbf16>
    %cst_98 = arith.constant dense<0.000000e+00> : vector<16x32xf32>
    %272 = tpu.matmul %270, %271, %cst_98 {dimension_numbers = #tpu.dot_dimension_numbers<[1], [0], [0], [1], [0, 0, 1, 1], [], []>} : vector<16x64xbf16>, vector<64x32xbf16>, vector<16x32xf32> -> vector<16x32xf32>
    %cst_99 = arith.constant 0.00951265544 : f32
    %273 = vector.broadcast %cst_99 : f32 to vector<16x32xf32>
    %274 = arith.addf %272, %273 : vector<16x32xf32>
    %275 = arith.mulf %274, %1 : vector<16x32xf32>
    %c0_100 = arith.constant 0 : index
    %c0_101 = arith.constant 0 : index
    %276 = vector.load %arg10[%c0_100, %c0_101] : memref<16x32xf32, #tpu.memory_space<vmem>>, vector<16x32xf32>
    tpu.vector_store %arg10[%c0_100, %c0_101], %275 {strides = array<i32>} : memref<16x32xf32, #tpu.memory_space<vmem>>, vector<16x32xf32>,
    return
  }
  func.func @transform_0(%arg0: i32) -> (i32, i32) {
    %c0_i32 = arith.constant 0 : i32
    %c0_i32_0 = arith.constant 0 : i32
    %c0_i32_1 = arith.constant 0 : i32
    return %c0_i32, %c0_i32_0 : i32, i32
  }
  func.func @transform_1(%arg0: i32) -> (i32, i32) {
    %c0_i32 = arith.constant 0 : i32
    %c0_i32_0 = arith.constant 0 : i32
    %c0_i32_1 = arith.constant 0 : i32
    return %c0_i32, %c0_i32_0 : i32, i32
  }
  func.func @transform_2(%arg0: i32) -> (i32, i32) {
    %c0_i32 = arith.constant 0 : i32
    %c0_i32_0 = arith.constant 0 : i32
    %c0_i32_1 = arith.constant 0 : i32
    return %c0_i32, %c0_i32_0 : i32, i32
  }
  func.func @transform_3(%arg0: i32) -> (i32, i32) {
    %c0_i32 = arith.constant 0 : i32
    %c0_i32_0 = arith.constant 0 : i32
    %c0_i32_1 = arith.constant 0 : i32
    return %c0_i32, %c0_i32_0 : i32, i32
  }
  func.func @transform_4(%arg0: i32) -> (i32, i32) {
    %c0_i32 = arith.constant 0 : i32
    %c0_i32_0 = arith.constant 0 : i32
    %c0_i32_1 = arith.constant 0 : i32
    return %c0_i32, %c0_i32_0 : i32, i32
  }
  func.func @transform_5(%arg0: i32) -> (i32, i32) {
    %c0_i32 = arith.constant 0 : i32
    %c0_i32_0 = arith.constant 0 : i32
    %c0_i32_1 = arith.constant 0 : i32
    return %c0_i32, %c0_i32_0 : i32, i32
  }
  func.func @transform_6(%arg0: i32) -> (i32, i32, i32) {
    %c0_i32 = arith.constant 0 : i32
    %c0_i32_0 = arith.constant 0 : i32
    %c0_i32_1 = arith.constant 0 : i32
    %c0_i32_2 = arith.constant 0 : i32
    return %c0_i32, %c0_i32_0, %c0_i32_1 : i32, i32, i32
  }
  func.func @transform_7(%arg0: i32) -> (i32, i32, i32) {
    %c0_i32 = arith.constant 0 : i32
    %c0_i32_0 = arith.constant 0 : i32
    %c0_i32_1 = arith.constant 0 : i32
    %c0_i32_2 = arith.constant 0 : i32
    return %c0_i32, %c0_i32_0, %c0_i32_1 : i32, i32, i32
  }
  func.func @transform_8(%arg0: i32) -> (i32, i32) {
    %c0_i32 = arith.constant 0 : i32
    %c0_i32_0 = arith.constant 0 : i32
    %c0_i32_1 = arith.constant 0 : i32
    return %c0_i32, %c0_i32_0 : i32, i32
  }
  func.func @transform_9(%arg0: i32) -> (i32, i32) {
    %c0_i32 = arith.constant 0 : i32
    %c0_i32_0 = arith.constant 0 : i32
    %c0_i32_1 = arith.constant 0 : i32
    return %c0_i32, %c0_i32_0 : i32, i32
  }
}

</mosaic_0001>

<bundles_post_ra>
// kernel: tpu_custom_call.1
= control target key start
LH: loop header
LB: loop body
LE: loop exit
PB: predicated region body
PF: predicated region fallthrough
CT: control target
= control target key end

     0   :  { %14 = vsyncpa [#allocation3], 0  ;;  %s2910_s0 = inlined_call_operand.vmem [shape: f32[16,128], index: 0, kind: input, shape index: {}]   ;;  %s2911_s1 = inlined_call_operand.hbm [shape: f32[16,32], index: 1, kind: input, shape index: {}]   ;;  %s2912_s2 = inlined_call_operand.hbm [shape: f32[128,128], index: 2, kind: input, shape index: {}]   ;;  %s2913_s3 = inlined_call_operand.hbm [shape: f32[32,32], index: 3, kind: input, shape index: {}]   ;;  %s2914_s4 = inlined_call_operand.hbm [shape: f32[64,64], index: 4, kind: input, shape index: {}]   ;;  %s2915_s5 = inlined_call_operand.vmem [shape: f32[6,128], index: 5, kind: input, shape index: {}]   ;;  %s2916_s6 = inlined_call_operand.hbm [shape: bf16[3,128,512], index: 6, kind: input, shape index: {}]   ;;  %s2917_s7 = inlined_call_operand.vmem [shape: bf16[3,32,64], index: 7, kind: input, shape index: {}]   ;;  %s2918_s8 = inlined_call_operand.vmem [shape: bf16[64,32], index: 8, kind: input, shape index: {}]   ;;  %s2919_s9 = inlined_call_operand.hbm [shape: f32[16,32], index: 9, kind: output, shape index: {}]  }
   0x1   :  { %15 = vsyncpa [#allocation6], 0 }
   0x2   :  { %16 = vsyncpa [#allocation9], 0 }
   0x3   :  { %17 = vsyncpa [#allocation4], 0  ;;  %s2527_s30 = smov [#allocation5]   ;;  %s2528_s11 = smov [#allocation8]  }
   0x4   :  { %s37_s10 = sshll.u32 %s2527_s30, 4  ;;  %s61_s12 = sshll.u32 %s2528_s11, 4  ;;  %s38_s10 = int_to_ptr.vmem [resolvable:$true] %s37_s10  ;;  %s2592_s12 = int_to_ptr.vmem [resolvable:$true] %s61_s12 }
   0x5   :  { %s2387_s15 = scalar_lea.hbm %s2912_s2, 2048 }
   0x6   :  { %p2388_p0 = scmp.ne.s32.totalorder %s2912_s2, %s2387_s15  ;;  %p2391_p1 = scmp.lt.u32.totalorder %s2387_s15, %s2912_s2 }
   0x8   :  { %p2393_p2 = pnand %p2391_p1, %p2388_p0 }
   0xa   :  { %2396 = shalt.err (!%p2393_p2)
}
   0xb   :  { %s2397_s20 = scalar_lea.vmem %s38_s10, 2048  ;;  %p2402_p4 = scmp.lt.s32.totalorder %s38_s10, %s38_s10 }
   0xc   :  { %p2398_p3 = scmp.ne.s32.totalorder %s38_s10, %s2397_s20  ;;  %p2403_p5 = scmp.lt.s32.totalorder %s2397_s20, %s2397_s20 }
   0xe   :  { %p2404_p6 = por %p2403_p5, %p2402_p4 }
  0x10   :  { %p2405_p7 = pnand %p2404_p6, %p2398_p3 }
  0x12   :  { %2408 = shalt.err (!%p2405_p7)
}
  0x13   :  { %s2529_s21 = smov 128   ;;  %s2530_s22 = smov 8  }
  0x14   :  { %43 = dma.hbm_to_vmem [thread:$0]  %s2912_s2, 2048, %s38_s10, [#allocation6], %s2529_s21, %s2529_s21, %s2530_s22  }
  0x15   :  { %s2409_s27 = scalar_lea.hbm %s2914_s4, 1024 }
  0x16   :  { %p2410_p8 = scmp.ne.s32.totalorder %s2914_s4, %s2409_s27  ;;  %p2413_p9 = scmp.lt.u32.totalorder %s2409_s27, %s2914_s4 }
  0x18   :  { %p2415_p10 = pnand %p2413_p9, %p2410_p8 }
  0x1a   :  { %2418 = shalt.err (!%p2415_p10)
}
  0x1b   :  { %s2419_s13 = scalar_lea.vmem %s2592_s12, 1024  ;;  %p2424_p12 = scmp.lt.s32.totalorder %s2592_s12, %s2592_s12 }
  0x1c   :  { %p2420_p11 = scmp.ne.s32.totalorder %s2592_s12, %s2419_s13  ;;  %p2425_p13 = scmp.lt.s32.totalorder %s2419_s13, %s2419_s13 }
  0x1e   :  { %p2426_p0 = por %p2425_p13, %p2424_p12 }
  0x20   :  { %p2427_p1 = pnand %p2426_p0, %p2420_p11 }
  0x22   :  { %2430 = shalt.err (!%p2427_p1)
}
  0x23   :  { %67 = dma.hbm_to_vmem [thread:$0]  %s2914_s4, 1024, %s2592_s12, [#allocation9], %s2529_s21, %s2529_s21, %s2530_s22  }
  0x24   :  { %s2531_s14 = smov [#allocation2]   ;;  %s2532_s16 = smov [#allocation7]  }
  0x25   :  { %s25_s15 = sshll.u32 %s2531_s14, 4  ;;  %s49_s17 = sshll.u32 %s2532_s16, 4  ;;  %s26_s15 = int_to_ptr.vmem [resolvable:$true] %s25_s15  ;;  %s2629_s17 = int_to_ptr.vmem [resolvable:$true] %s49_s17 }
  0x26   :  { %s2431_s20 = scalar_lea.hbm %s2911_s1, 256 }
  0x27   :  { %p2432_p2 = scmp.ne.s32.totalorder %s2911_s1, %s2431_s20  ;;  %p2435_p3 = scmp.lt.u32.totalorder %s2431_s20, %s2911_s1 }
  0x29   :  { %p2437_p4 = pnand %p2435_p3, %p2432_p2 }
  0x2b   :  { %2440 = shalt.err (!%p2437_p4)
}
  0x2c   :  { %s2441_s4 = scalar_lea.vmem %s26_s15, 256  ;;  %p2446_p6 = scmp.lt.s32.totalorder %s26_s15, %s26_s15 }
  0x2d   :  { %p2442_p5 = scmp.ne.s32.totalorder %s26_s15, %s2441_s4  ;;  %p2447_p7 = scmp.lt.s32.totalorder %s2441_s4, %s2441_s4 }
  0x2f   :  { %p2448_p8 = por %p2447_p7, %p2446_p6 }
  0x31   :  { %p2449_p9 = pnand %p2448_p8, %p2442_p5 }
  0x33   :  { %2452 = shalt.err (!%p2449_p9)
}
  0x34   :  { %31 = dma.hbm_to_vmem [thread:$0]  %s2911_s1, 256, %s26_s15, [#allocation3], %s2529_s21, %s2529_s21, %s2530_s22  }
  0x35   :  { %s2453_s30 = scalar_lea.hbm %s2913_s3, 512 }
  0x36   :  { %p2454_p10 = scmp.ne.s32.totalorder %s2913_s3, %s2453_s30  ;;  %p2457_p11 = scmp.lt.u32.totalorder %s2453_s30, %s2913_s3 }
  0x38   :  { %p2459_p12 = pnand %p2457_p11, %p2454_p10 }
  0x3a   :  { %2462 = shalt.err (!%p2459_p12)
}
  0x3b   :  { %s2463_s14 = scalar_lea.vmem %s2629_s17, 512  ;;  %p2468_p0 = scmp.lt.s32.totalorder %s2629_s17, %s2629_s17 }
  0x3c   :  { %p2464_p13 = scmp.ne.s32.totalorder %s2629_s17, %s2463_s14  ;;  %p2469_p1 = scmp.lt.s32.totalorder %s2463_s14, %s2463_s14 }
  0x3e   :  { %p2470_p2 = por %p2469_p1, %p2468_p0 }
  0x40   :  { %p2471_p3 = pnand %p2470_p2, %p2464_p13 }
  0x42   :  { %2474 = shalt.err (!%p2471_p3)
}
  0x43   :  { %55 = dma.hbm_to_vmem [thread:$0]  %s2913_s3, 512, %s2629_s17, [#allocation6], %s2529_s21, %s2529_s21, %s2530_s22  }
  0x44   :  { %s2533_s16 = smov [#allocation10]   ;;  %s2475_s23 = scalar_lea.hbm %s2916_s6, 12288 }
  0x45   :  { %s75_s18 = sshll.u32 %s2533_s16, 4  ;;  %p2476_p4 = scmp.ne.s32.totalorder %s2916_s6, %s2475_s23  ;;  %s76_s18 = int_to_ptr.vmem [resolvable:$true] %s75_s18 }
  0x46   :  { %p2479_p5 = scmp.lt.u32.totalorder %s2475_s23, %s2916_s6 }
  0x48   :  { %p2481_p6 = pnand %p2479_p5, %p2476_p4 }
  0x4a   :  { %2484 = shalt.err (!%p2481_p6)
}
  0x4b   :  { %s2485_s12 = scalar_lea.vmem %s76_s18, 12288  ;;  %p2490_p8 = scmp.lt.s32.totalorder %s76_s18, %s76_s18 }
  0x4c   :  { %p2486_p7 = scmp.ne.s32.totalorder %s76_s18, %s2485_s12  ;;  %p2491_p9 = scmp.lt.s32.totalorder %s2485_s12, %s2485_s12 }
  0x4e   :  { %p2492_p10 = por %p2491_p9, %p2490_p8 }
  0x50   :  { %p2493_p11 = pnand %p2492_p10, %p2486_p7 }
  0x52   :  { %2496 = shalt.err (!%p2493_p11)
}
  0x53   :  { %s2534_s3 = smov 256   ;;  %s2535_s17 = smov 16  }
  0x54   :  { %81 = dma.hbm_to_vmem [thread:$0]  %s2916_s6, 12288, %s76_s18, [#allocation9], %s2534_s3, %s2534_s3, %s2535_s17  }
  0x55   :  { %2519 = dma.done.wait [#allocation3], 256  }
  0x56   :  { %2520 = vsyncadd [#allocation3], 4294967040 }
  0x57   :  { %2521 = dma.done.wait [#allocation6], 2560  }
  0x58   :  { %2522 = vsyncadd [#allocation6], 4294964736 }
  0x59   :  { %2523 = dma.done.wait [#allocation9], 13312  }
  0x5a   :  { %2524 = vsyncadd [#allocation9], 4294953984  ;;  %v2536_v0 = vmov 0.0|0.0   ;;  %vm2537_vm0 = vmmov 0   ;;  %v2538_v1 = vmov 0.0   ;;  %v134_v2 = vld [vmem:[#allocation5] sm:$0xff] }
  0x5b   :  { %2130 = vmatprep.subr.bf16.mxu0 %v2536_v0  ;;  %2061 = vmatprep.mubr.msk.f32.mxu0 %vm2537_vm0, %v2538_v1  ;;  %v135_v3 = vld [vmem:[#allocation5 + $0x8] sm:$0xff]  ;;  %v136_v4 = vld [vmem:[#allocation5 + $0x10] sm:$0xff]  ;;  %v137_v6 = vld [vmem:[#allocation5 + $0x18] sm:$0xff]  ;;  %vm166_vm1 = vcmask 1040384   ;;  %vm329_vm8 = vcmask 1046528   ;;  %vm1195_vm9 = vcmask 261120  }
  0x5c   :  { %v2131_v5 = vpack.c.bf16 %v135_v3, %v134_v2  ;;  %v2134_v7 = vpack.c.bf16 %v137_v6, %v136_v4  ;;  %v138_v8 = vld [vmem:[#allocation5 + $0x20] sm:$0xff]  ;;  %v139_v9 = vld [vmem:[#allocation5 + $0x28] sm:$0xff]  ;;  %v2685_v10 = vld [vmem:[%s2910_s0] sm:$0xff]  ;;  %vm1585_vm12 = vcmask 523264  }
  0x5d   :  { %v2690_v11 = vld [vmem:[%s2910_s0 + $0x8] sm:$0xff]  ;;  %v140_v12 = vld [vmem:[#allocation5 + $0x30] sm:$0xff]  ;;  %v157_v15 = vmul.f32 %v2685_v10, %v2685_v10  ;;  %v2137_v17 = vpack.c.bf16 %v139_v9, %v138_v8  ;;  %v142_v20 = vld [vmem:[#allocation5 + $0x40] sm:$0xff] }
  0x5e   :  { %2132 = vmatpush3.bf16.msra.mxu0 %v2131_v5  ;;  %v141_v13 = vld [vmem:[#allocation5 + $0x38] sm:$0xff]  ;;  %v150_v14 = vadd.f32 %v2690_v11, %v2685_v10  ;;  %v158_v16 = vmul.f32 %v2690_v11, %v2690_v11  ;;  %v143_v21 = vld [vmem:[#allocation5 + $0x48] sm:$0xff]  ;;  %v144_v26 = vld [vmem:[#allocation5 + $0x50] sm:$0xff] }
  0x5f   :  { %2133 = vmatprep.subr.bf16.mxu0 %v2536_v0  ;;  %v2140_v23 = vpack.c.bf16 %v141_v13, %v140_v12  ;;  %v145_v27 = vld [vmem:[#allocation5 + $0x58] sm:$0xff]  ;;  %v2143_v28 = vpack.c.bf16 %v143_v21, %v142_v20  ;;  %v146_v31 = vld [vmem:[#allocation5 + $0x60] sm:$0xff]  ;;  %v147_v32 = vld [vmem:[#allocation5 + $0x68] sm:$0xff] }
  0x60   :  { %v151_v18 = vrot.slane %v150_v14, 4  ;;  %v159_v19 = vadd.f32 %v158_v16, %v157_v15  ;;  %v2146_v33 = vpack.c.bf16 %v145_v27, %v144_v26  ;;  %v148_v36 = vld [vmem:[#allocation5 + $0x70] sm:$0xff]  ;;  %v149_v37 = vld [vmem:[#allocation5 + $0x78] sm:$0xff]  ;;  %v2149_v38 = vpack.c.bf16 %v147_v32, %v146_v31 }
  0x61   :  { %v2152_v41 = vpack.c.bf16 %v149_v37, %v148_v36  ;;  %v2203_v45 = vld [vmem:[#allocation10 + $0x4] ss:$16 sps:$4 sm:$0xff]   ;;  %v2207_v46 = vld [vmem:[#allocation10 + $0xc] ss:$16 sps:$4 sm:$0xff]   ;;  %v2205_v47 = vld [vmem:[#allocation10 + $0x8] ss:$16 sps:$4 sm:$0xff]  }
  0x62   :  { %2135 = vmatpush3.bf16.msra.mxu0 %v2134_v7  ;;  %v160_v22 = vrot.slane %v159_v19, 4  ;;  %v152_v24 = vadd.f32 %v151_v18, %v150_v14  ;;  %v2208_v48 = vld [vmem:[#allocation10] ss:$16 sps:$4 sm:$0xff]   ;;  %566 = vmatprep.subr.bf16.mxu1 %v2203_v45  ;;  %v2209_v49 = vld [vmem:[#allocation10 + $0x24] ss:$16 sps:$4 sm:$0xff]  }
  0x63   :  { %2136 = vmatprep.subr.bf16.mxu0 %v2536_v0  ;;  %567 = vmatpush1.bf16.msra.mxu1 %v2208_v48  ;;  %v2213_v50 = vld [vmem:[#allocation10 + $0x2c] ss:$16 sps:$4 sm:$0xff]   ;;  %v2211_v51 = vld [vmem:[#allocation10 + $0x28] ss:$16 sps:$4 sm:$0xff]   ;;  %v2214_v52 = vld [vmem:[#allocation10 + $0x20] ss:$16 sps:$4 sm:$0xff]  }
  0x64   :  { %v161_v25 = vadd.f32 %v160_v22, %v159_v19  ;;  %v153_v29 = vrot.slane %v152_v24, 2  ;;  %568 = vmatprep.subr.bf16.mxu1 %v2209_v49  ;;  %v2215_v53 = vld [vmem:[#allocation10 + $0x44] ss:$16 sps:$4 sm:$0xff]   ;;  %v2219_v54 = vld [vmem:[#allocation10 + $0x4c] ss:$16 sps:$4 sm:$0xff]   ;;  %v2539_v19 = vmov 0  }
  0x65   :  { %v2217_v55 = vld [vmem:[#allocation10 + $0x48] ss:$16 sps:$4 sm:$0xff]   ;;  %v2220_v56 = vld [vmem:[#allocation10 + $0x40] ss:$16 sps:$4 sm:$0xff]   ;;  %v2221_v57 = vld [vmem:[#allocation10 + $0x64] ss:$16 sps:$4 sm:$0xff]   ;;  %598 = vmatprep.mubr.bf16.mxu1 %v2539_v19 }
  0x66   :  { %2138 = vmatpush3.bf16.msra.mxu0 %v2137_v17  ;;  %v162_v30 = vrot.slane %v161_v25, 2  ;;  %v154_v34 = vadd.f32 %v153_v29, %v152_v24  ;;  %v2225_v58 = vld [vmem:[#allocation10 + $0x6c] ss:$16 sps:$4 sm:$0xff]   ;;  %v2223_v59 = vld [vmem:[#allocation10 + $0x68] ss:$16 sps:$4 sm:$0xff]  }
  0x67   :  { %2139 = vmatprep.subr.bf16.mxu0 %v2536_v0  ;;  %569 = vmatpush1.bf16.msra.mxu1 %v2214_v52  ;;  %v2226_v60 = vld [vmem:[#allocation10 + $0x60] ss:$16 sps:$4 sm:$0xff]   ;;  %v2227_v61 = vld [vmem:[#allocation10 + $0x84] ss:$16 sps:$4 sm:$0xff]   ;;  %v2231_v62 = vld [vmem:[#allocation10 + $0x8c] ss:$16 sps:$4 sm:$0xff]  }
  0x68   :  { %v163_v35 = vadd.f32 %v162_v30, %v161_v25  ;;  %v155_v39 = vrot.slane %v154_v34, 1  ;;  %570 = vmatprep.subr.bf16.mxu1 %v2215_v53  ;;  %v2229_v63 = vld [vmem:[#allocation10 + $0x88] ss:$16 sps:$4 sm:$0xff]   ;;  %v2232_v2 = vld [vmem:[#allocation10 + $0x80] ss:$16 sps:$4 sm:$0xff]   ;;  %v107_v25 = vlaneseq }
  0x69   :  { %v2233_v3 = vld [vmem:[#allocation10 + $0xa4] ss:$16 sps:$4 sm:$0xff]   ;;  %v2237_v4 = vld [vmem:[#allocation10 + $0xac] ss:$16 sps:$4 sm:$0xff]   ;;  %v2235_v5 = vld [vmem:[#allocation10 + $0xa8] ss:$16 sps:$4 sm:$0xff]  }
  0x6a   :  { %2141 = vmatpush3.bf16.msra.mxu0 %v2140_v23  ;;  %v164_v40 = vrot.slane %v163_v35, 1  ;;  %v156_v42 = vadd.f32 %v155_v39, %v154_v34  ;;  %v2238_v6 = vld [vmem:[#allocation10 + $0xa0] ss:$16 sps:$4 sm:$0xff]   ;;  %v2239_v7 = vld [vmem:[#allocation10 + $0xc4] ss:$16 sps:$4 sm:$0xff]   ;;  %v2707_v27 = vshrl.u32 %v107_v25, 7 }
  0x6b   :  { %2142 = vmatprep.subr.bf16.mxu0 %v2536_v0  ;;  %571 = vmatpush1.bf16.msra.mxu1 %v2220_v56  ;;  %v2243_v8 = vld [vmem:[#allocation10 + $0xcc] ss:$16 sps:$4 sm:$0xff]   ;;  %v2241_v9 = vld [vmem:[#allocation10 + $0xc8] ss:$16 sps:$4 sm:$0xff]   ;;  %v2244_v12 = vld [vmem:[#allocation10 + $0xc0] ss:$16 sps:$4 sm:$0xff]  }
  0x6c   :  { %v165_v43 = vadd.f32 %v164_v40, %v163_v35  ;;  %572 = vmatprep.subr.bf16.mxu1 %v2221_v57  ;;  %v2245_v13 = vld [vmem:[#allocation10 + $0xe4] ss:$16 sps:$4 sm:$0xff]   ;;  %v2249_v14 = vld [vmem:[#allocation10 + $0xec] ss:$16 sps:$4 sm:$0xff]   ;;  %v2247_v15 = vld [vmem:[#allocation10 + $0xe8] ss:$16 sps:$4 sm:$0xff]   ;;  %v110_v57 = vcvt.s32.f32 %v2707_v27 }
  0x6d   :  { %v2250_v16 = vld [vmem:[#allocation10 + $0xe0] ss:$16 sps:$4 sm:$0xff]   ;;  %v2253_v17 = vld [vmem:[#allocation10 + $0x104] ss:$16 sps:$4 sm:$0xff]   ;;  %v2256_v18 = vld [vmem:[#allocation10 + $0x10c] ss:$16 sps:$4 sm:$0xff]  }
  0x6e   :  { %2144 = vmatpush3.bf16.msra.mxu0 %v2143_v28  ;;  %v167_v44 = vsel %vm166_vm1, %v156_v42, %v165_v43  ;;  %v2712_v28 = vld [vmem:[%s2915_s5] sm:$0x3f]  ;;  %v2715_v29 = vsub.s32 0, %v2707_v27  ;;  %v2720_v32 = vsub.s32 1, %v2707_v27 }
  0x6f   :  { %2145 = vmatprep.subr.bf16.mxu0 %v2536_v0  ;;  %573 = vmatpush1.bf16.msra.mxu1 %v2226_v60  ;;  %v252_v30 = vrot.slane %v2712_v28, 7 }
  0x70   :  { %574 = vmatprep.subr.bf16.mxu1 %v2227_v61 }
  0x72   :  { %2147 = vmatpush3.bf16.msra.mxu0 %v2146_v33 }
  0x73   :  { %2148 = vmatprep.subr.bf16.mxu0 %v2536_v0  ;;  %575 = vmatpush1.bf16.msra.mxu1 %v2232_v2 }
  0x74   :  { %576 = vmatprep.subr.bf16.mxu1 %v2233_v3  ;;  %v112_v3 = vadd.f32 0.5, %v110_v57 }
  0x76   :  { %2150 = vmatpush3.bf16.msra.mxu0 %v2149_v38  ;;  %v264_v38 = vrot.slane %v2712_v28, %v2720_v32 }
  0x77   :  { %2151 = vmatprep.subr.bf16.mxu0 %v2536_v0  ;;  %577 = vmatpush1.bf16.msra.mxu1 %v2238_v6 }
  0x78   :  { %578 = vmatprep.subr.bf16.mxu1 %v2239_v7 }
  0x7a   :  { %2153 = vmatpush3.bf16.msra.mxu0 %v2152_v41 }
  0x7b   :  { %609 = vmatprep.subr.bf16.mxu0 %v2207_v46  ;;  %579 = vmatpush1.bf16.msra.mxu1 %v2244_v12 }
  0x7c   :  { %580 = vmatprep.subr.bf16.mxu1 %v2245_v13 }
  0x7d   :  { %2062 = vmatmul.mubr.f32.vlgmr.msra.gmra.mrb[0].mxu0 %v167_v44 }
  0x7e   :  { %610 = vmatpush1.bf16.msra.mxu0 %v2205_v47  ;;  %641 = vmatprep.mubr.bf16.mxu0 %v2539_v19 }
  0x7f   :  { %611 = vmatprep.subr.bf16.mxu0 %v2213_v50  ;;  %581 = vmatpush1.bf16.msra.mxu1 %v2250_v16 }
  0x80   :  { %812 = vmatprep.subr.bf16.mxu1 %v2253_v17 }
  0x82   :  { %612 = vmatpush1.bf16.msra.mxu0 %v2211_v51  ;;  %v109_v51 = vadd.s32 8, %v2707_v27 }
  0x83   :  { %613 = vmatprep.subr.bf16.mxu0 %v2219_v54 }
  0x86   :  { %614 = vmatpush1.bf16.msra.mxu0 %v2217_v55 }
  0x87   :  { %615 = vmatprep.subr.bf16.mxu0 %v2225_v58 }
  0x8a   :  { %616 = vmatpush1.bf16.msra.mxu0 %v2223_v59  ;;  %v111_v59 = vcvt.s32.f32 %v109_v51 }
  0x8b   :  { %617 = vmatprep.subr.bf16.mxu0 %v2231_v62 }
  0x8e   :  { %618 = vmatpush1.bf16.msra.mxu0 %v2229_v63 }
  0x8f   :  { %619 = vmatprep.subr.bf16.mxu0 %v2237_v4 }
  0x92   :  { %620 = vmatpush1.bf16.msra.mxu0 %v2235_v5  ;;  %v113_v5 = vadd.f32 0.5, %v111_v59 }
  0x93   :  { %621 = vmatprep.subr.bf16.mxu0 %v2243_v8 }
  0x94   :  { %v115_v13 = vmul.f32 0.125, %v113_v5  ;;  %v2259_v5 = vld [vmem:[#allocation10 + $0x124] ss:$16 sps:$4 sm:$0xff]  }
  0x96   :  { %622 = vmatpush1.bf16.msra.mxu0 %v2241_v9  ;;  %v114_v9 = vmul.f32 0.125, %v112_v3  ;;  %v2254_v3 = vld [vmem:[#allocation10 + $0x108] ss:$16 sps:$4 sm:$0xff]  }
  0x97   :  { %623 = vmatprep.subr.bf16.mxu0 %v2249_v14 }
  0x98   :  { %v116_v17 = vfloor.f32 %v114_v9  ;;  %v2260_v9 = vld [vmem:[#allocation10 + $0x128] ss:$16 sps:$4 sm:$0xff]  }
  0x9a   :  { %624 = vmatpush1.bf16.msra.mxu0 %v2247_v15 }
  0x9b   :  { %855 = vmatprep.subr.bf16.mxu0 %v2256_v18 }
 0x150   :  { %v234_v20 = vpop.f32.mrb[0].mxu0 }
 0x151   :  { %v238_v21 = vmul.f32 %v234_v20, %v234_v20  ;;  %v2063_v22 = vpop.f32.mrb[1].mxu0  ;;  %v248_v31 = vrot.slane %v234_v20, %v2715_v29 }
 0x153   :  { %v240_v23 = vrot.slane %v238_v21, 7  ;;  %v249_v35 = vsub.f32 %v2685_v10, %v248_v31  ;;  %v250_v36 = vsub.f32 %v2690_v11, %v248_v31 }
 0x155   :  { %v242_v24 = vsub.f32 %v234_v20, %v240_v23  ;;  %v117_v20 = vfloor.f32 %v115_v13  ;;  %v2268_v13 = vld [vmem:[#allocation10 + $0x14c] ss:$16 sps:$4 sm:$0xff]  }
 0x157   :  { %v243_v26 = vadd.f32 1e-05, %v242_v24  ;;  %v118_v24 = vmul.f32 8.0, %v116_v17  ;;  %v2274_v17 = vld [vmem:[#allocation10 + $0x16c] ss:$16 sps:$4 sm:$0xff]  }
 0x159   :  { %2357 = vrsqrt.f32 %v243_v26 }
 0x163   :  { %v2358_v33 = vpop.eup %2357 }
 0x164   :  { %v254_v34 = vmul.f32 %v2358_v33, %v252_v30  ;;  %v119_v30 = vmul.f32 8.0, %v117_v20  ;;  %v2272_v20 = vld [vmem:[#allocation10 + $0x168] ss:$16 sps:$4 sm:$0xff]  }
 0x166   :  { %v258_v37 = vrot.slane %v254_v34, %v2720_v32 }
 0x168   :  { %v259_v39 = vmul.f32 %v258_v37, %v249_v35  ;;  %v260_v40 = vmul.f32 %v258_v37, %v250_v36  ;;  %v120_v36 = vsub.f32 %v110_v57, %v118_v24  ;;  %v2540_v37 = vmov -1.0   ;;  %v2278_v24 = vld [vmem:[#allocation10 + $0x188] ss:$16 sps:$4 sm:$0xff]  }
 0x16a   :  { %v2727_v41 = vadd.f32 %v264_v38, %v259_v39  ;;  %v2729_v42 = vadd.f32 %v264_v38, %v260_v40  ;;  %v121_v40 = vsub.f32 %v111_v59, %v119_v30  ;;  %vm122_vm4 = vcmp.gt.f32.partialorder %v120_v36, 0.5  ;;  %v2281_v30 = vld [vmem:[#allocation10 + $0x1a0] ss:$16 sps:$4 sm:$0xff]  }
 0x16b   :  { %vm128_vm6 = vcmp.lt.f32.partialorder %v120_v36, 6.5  ;;  %v2290_v36 = vld [vmem:[#allocation10 + $0x1c8] ss:$16 sps:$4 sm:$0xff]  }
 0x16c   :  { %v269_v43 = vmul.f32 0.70710677, %v2727_v41  ;;  %v270_v44 = vmul.f32 0.70710677, %v2729_v42  ;;  %vm123_vm5 = vcmp.gt.f32.partialorder %v121_v40, 0.5  ;;  %vm129_vm7 = vcmp.lt.f32.partialorder %v121_v40, 6.5 }
 0x16d   :  { %v2747_v51 = vsel %vm123_vm5, 1.0, %v2538_v1  ;;  %v2293_v40 = vld [vmem:[#allocation10 + $0x1e0] ss:$16 sps:$4 sm:$0xff]  }
 0x16e   :  { %v275_v45 = vand.u32 2147483647, %v269_v43  ;;  %v276_v46 = vand.u32 2147483647, %v270_v44  ;;  %vm271_vm2 = vcmp.ge.f32.partialorder %v269_v43, 0.0  ;;  %vm272_vm3 = vcmp.ge.f32.partialorder %v270_v44, 0.0 }
 0x16f   :  { %v273_v38 = vsel %vm271_vm2, 1.0, %v2540_v37  ;;  %v268_v43 = vmul.f32 0.5, %v2729_v42 }
 0x170   :  { %v277_v10 = vmul.f32 0.3275911, %v275_v45  ;;  %v278_v47 = vmul.f32 0.3275911, %v276_v46  ;;  %v301_v49 = vsub.f32 0.0, %v275_v45  ;;  %v302_v50 = vsub.f32 0.0, %v276_v46 }
 0x172   :  { %v279_v11 = vadd.f32 1.0, %v277_v10  ;;  %v280_v48 = vadd.f32 1.0, %v278_v47  ;;  %v303_v53 = vmul.f32 %v301_v49, %v275_v45  ;;  %v304_v56 = vmul.f32 %v302_v50, %v276_v46 }
 0x173   :  { %v274_v45 = vsel %vm272_vm3, 1.0, %v2540_v37  ;;  %v267_v47 = vmul.f32 0.5, %v2727_v41  ;;  %v2744_v50 = vsel %vm122_vm4, 1.0, %v2538_v1 }
 0x174   :  { %2359 = vrcp.f32 %v279_v11  ;;  %v305_v62 = vmul.f32 1.442695, %v303_v53  ;;  %v307_v2 = vmul.f32 1.442695, %v304_v56  ;;  %v2753_v53 = vsel %vm128_vm6, 1.0, %v2538_v1 }
 0x175   :  { %2361 = vrcp.f32 %v280_v48 }
 0x176   :  { %2363 = vpow2.f32 %v305_v62 }
 0x177   :  { %2365 = vpow2.f32 %v307_v2  ;;  %v2251_v2 = vld [vmem:[#allocation10 + $0x100] ss:$16 sps:$4 sm:$0xff]  }
 0x17e   :  { %v2360_v52 = vpop.eup %2359 }
 0x17f   :  { %v2362_v54 = vpop.eup %2361  ;;  %v283_v55 = vmul.f32 1.0614054, %v2360_v52 }
 0x180   :  { %v284_v58 = vmul.f32 1.0614054, %v2362_v54  ;;  %v2364_v25 = vpop.eup %2363 }
 0x181   :  { %v285_v60 = vadd.f32 -1.4531521, %v283_v55  ;;  %v2366_v31 = vpop.eup %2365 }
 0x182   :  { %v286_v61 = vadd.f32 -1.4531521, %v284_v58 }
 0x183   :  { %v287_v63 = vmul.f32 %v2360_v52, %v285_v60 }
 0x184   :  { %v288_v4 = vmul.f32 %v2362_v54, %v286_v61 }
 0x185   :  { %v289_v6 = vadd.f32 1.4214138, %v287_v63 }
 0x186   :  { %v290_v7 = vadd.f32 1.4214138, %v288_v4 }
 0x187   :  { %v291_v8 = vmul.f32 %v2360_v52, %v289_v6  ;;  %v2262_v6 = vld [vmem:[#allocation10 + $0x12c] ss:$16 sps:$4 sm:$0xff]  }
 0x188   :  { %v292_v12 = vmul.f32 %v2362_v54, %v290_v7 }
 0x189   :  { %v293_v14 = vadd.f32 -0.28449672, %v291_v8  ;;  %v2257_v8 = vld [vmem:[#allocation10 + $0x120] ss:$16 sps:$4 sm:$0xff]  }
 0x18a   :  { %v294_v15 = vadd.f32 -0.28449672, %v292_v12  ;;  %v2265_v12 = vld [vmem:[#allocation10 + $0x144] ss:$16 sps:$4 sm:$0xff]  }
 0x18b   :  { %v295_v16 = vmul.f32 %v2360_v52, %v293_v14  ;;  %v2263_v14 = vld [vmem:[#allocation10 + $0x140] ss:$16 sps:$4 sm:$0xff]  }
 0x18c   :  { %v296_v18 = vmul.f32 %v2362_v54, %v294_v15  ;;  %v2266_v15 = vld [vmem:[#allocation10 + $0x148] ss:$16 sps:$4 sm:$0xff]  }
 0x18d   :  { %v297_v21 = vadd.f32 0.2548296, %v295_v16  ;;  %v2271_v16 = vld [vmem:[#allocation10 + $0x164] ss:$16 sps:$4 sm:$0xff]  }
 0x18e   :  { %v298_v22 = vadd.f32 0.2548296, %v296_v18  ;;  %v2269_v18 = vld [vmem:[#allocation10 + $0x160] ss:$16 sps:$4 sm:$0xff]  }
 0x18f   :  { %v299_v23 = vmul.f32 %v2360_v52, %v297_v21  ;;  %v2277_v21 = vld [vmem:[#allocation10 + $0x184] ss:$16 sps:$4 sm:$0xff]  }
 0x190   :  { %v300_v26 = vmul.f32 %v2362_v54, %v298_v22  ;;  %v2756_v54 = vsel %vm129_vm7, 1.0, %v2538_v1  ;;  %v2280_v22 = vld [vmem:[#allocation10 + $0x18c] ss:$16 sps:$4 sm:$0xff]  }
 0x191   :  { %v309_v33 = vmul.f32 %v2364_v25, %v299_v23  ;;  %v2275_v23 = vld [vmem:[#allocation10 + $0x180] ss:$16 sps:$4 sm:$0xff]   ;;  %v2283_v25 = vld [vmem:[#allocation10 + $0x1a4] ss:$16 sps:$4 sm:$0xff]  }
 0x192   :  { %v310_v34 = vmul.f32 %v2366_v31, %v300_v26  ;;  %v2286_v26 = vld [vmem:[#allocation10 + $0x1ac] ss:$16 sps:$4 sm:$0xff]   ;;  %v2284_v31 = vld [vmem:[#allocation10 + $0x1a8] ss:$16 sps:$4 sm:$0xff]  }
 0x193   :  { %v311_v35 = vsub.f32 1.0, %v309_v33  ;;  %v2289_v33 = vld [vmem:[#allocation10 + $0x1c4] ss:$16 sps:$4 sm:$0xff]  }
 0x194   :  { %v312_v39 = vsub.f32 1.0, %v310_v34  ;;  %v2292_v34 = vld [vmem:[#allocation10 + $0x1cc] ss:$16 sps:$4 sm:$0xff]  }
 0x195   :  { %v313_v46 = vmul.f32 %v311_v35, %v273_v38  ;;  %v2287_v35 = vld [vmem:[#allocation10 + $0x1c0] ss:$16 sps:$4 sm:$0xff]   ;;  %v2295_v38 = vld [vmem:[#allocation10 + $0x1e4] ss:$16 sps:$4 sm:$0xff]  }
 0x196   :  { %v314_v10 = vmul.f32 %v312_v39, %v274_v45  ;;  %v2298_v39 = vld [vmem:[#allocation10 + $0x1ec] ss:$16 sps:$4 sm:$0xff]   ;;  %v2296_v45 = vld [vmem:[#allocation10 + $0x1e8] ss:$16 sps:$4 sm:$0xff]  }
 0x197   :  { %v315_v11 = vadd.f32 1.0, %v313_v46  ;;  %v2301_v46 = vld [vmem:[#allocation10 + $0x204] ss:$16 sps:$4 sm:$0xff]  }
 0x198   :  { %v316_v48 = vadd.f32 1.0, %v314_v10  ;;  %v2304_v10 = vld [vmem:[#allocation10 + $0x20c] ss:$16 sps:$4 sm:$0xff]  }
 0x199   :  { %v2739_v44 = vmul.f32 %v315_v11, %v267_v47  ;;  %v2299_v47 = vld [vmem:[#allocation10 + $0x200] ss:$16 sps:$4 sm:$0xff]   ;;  %v2302_v11 = vld [vmem:[#allocation10 + $0x208] ss:$16 sps:$4 sm:$0xff]  }
 0x19a   :  { %v2741_v49 = vmul.f32 %v316_v48, %v268_v43  ;;  %v2307_v48 = vld [vmem:[#allocation10 + $0x224] ss:$16 sps:$4 sm:$0xff]  }
 0x19b   :  { %v321_v41 = vrot.slane %v2739_v44, 7  ;;  %v330_v52 = vrot.slane %v2739_v44, 1 }
 0x19c   :  { %v322_v42 = vrot.slane %v2741_v49, 7  ;;  %v331_v55 = vrot.slane %v2741_v49, 1  ;;  %v339_v43 = vpack.c.bf16 %v2741_v49, %v2739_v44 }
 0x19d   :  { %v326_v56 = vsel %vm166_vm1, 0.0, %v321_v41 }
 0x19e   :  { %v323_v57 = vsel %vm166_vm1, %v321_v41, %v322_v42  ;;  %v327_v58 = vmul.f32 %v2744_v50, %v326_v56  ;;  %v332_v59 = vsel %vm329_vm8, %v330_v52, %v331_v55  ;;  %v335_v60 = vsel %vm329_vm8, %v331_v55, 0.0  ;;  %v2310_v41 = vld [vmem:[#allocation10 + $0x22c] ss:$16 sps:$4 sm:$0xff]   ;;  %v2773_v52 = vld [vmem:[#allocation2] sm:$0xff]  ;;  %v2308_v56 = vld [vmem:[#allocation10 + $0x228] ss:$16 sps:$4 sm:$0xff]  }
 0x19f   :  { %v328_v61 = vmul.f32 %v2747_v51, %v323_v57  ;;  %v336_v62 = vmul.f32 %v2753_v53, %v332_v59  ;;  %v337_v63 = vmul.f32 %v2756_v54, %v335_v60  ;;  %v2775_v42 = vld [vmem:[#allocation2 + $0x8] sm:$0xff]  ;;  %v2305_v55 = vld [vmem:[#allocation10 + $0x220] ss:$16 sps:$4 sm:$0xff]   ;;  %v2313_v57 = vld [vmem:[#allocation10 + $0x244] ss:$16 sps:$4 sm:$0xff]   ;;  %v1205_v44 = vmul.f32 %v2773_v52, %v2773_v52 }
 0x1a0   :  { %v1206_v49 = vmul.f32 %v2775_v42, %v2775_v42  ;;  %v2311_v59 = vld [vmem:[#allocation10 + $0x240] ss:$16 sps:$4 sm:$0xff]   ;;  %v2314_v60 = vld [vmem:[#allocation10 + $0x248] ss:$16 sps:$4 sm:$0xff]  }
 0x1a1   :  { %v338_v4 = vpack.c.bf16 %v328_v61, %v327_v58  ;;  %v2767_v7 = vpack.c.bf16 %v337_v63, %v336_v62  ;;  %v2316_v58 = vld [vmem:[#allocation10 + $0x24c] ss:$16 sps:$4 sm:$0xff]   ;;  %v2319_v61 = vld [vmem:[#allocation10 + $0x264] ss:$16 sps:$4 sm:$0xff]   ;;  %v1196_v63 = vsel %vm1195_vm9, %v2773_v52, 0.0 }
 0x1a2   :  { %v2322_v62 = vld [vmem:[#allocation10 + $0x26c] ss:$16 sps:$4 sm:$0xff]  }
 0x1a3   :  { %599 = vmatmul.mubr.bf16.vlgmr.msra.gmra.mrb[0].mxu1 %v338_v4  ;;  %642 = vmatmul.mubr.bf16.vlgmr.msra.gmra.mrb[4].mxu0 %v338_v4  ;;  %v1208_v4 = vsel %vm1195_vm9, %v1206_v49, 0.0 }
 0x1a4   :  { %813 = vmatpush1.bf16.msra.mxu1 %v2251_v2  ;;  %856 = vmatpush1.bf16.msra.mxu0 %v2254_v3  ;;  %v1197_v2 = vsel %vm1195_vm9, %v2775_v42, 0.0  ;;  %v1207_v3 = vsel %vm1195_vm9, %v1205_v44, 0.0 }
 0x1a5   :  { %814 = vmatprep.subr.bf16.mxu1 %v2259_v5  ;;  %857 = vmatprep.subr.bf16.mxu0 %v2262_v6  ;;  %v2320_v5 = vld [vmem:[#allocation10 + $0x268] ss:$16 sps:$4 sm:$0xff]   ;;  %v1198_v6 = vadd.f32 %v1197_v2, %v1196_v63 }
 0x1a6   :  { %844 = vmatprep.mubr.bf16.mxu1 %v2539_v19  ;;  %887 = vmatprep.mubr.bf16.mxu0 %v2539_v19 }
 0x1a8   :  { %815 = vmatpush1.bf16.msra.mxu1 %v2257_v8  ;;  %858 = vmatpush1.bf16.msra.mxu0 %v2260_v9  ;;  %v1209_v8 = vadd.f32 %v1208_v4, %v1207_v3  ;;  %v2325_v9 = vld [vmem:[#allocation10 + $0x284] ss:$16 sps:$4 sm:$0xff]  }
 0x1a9   :  { %816 = vmatprep.subr.bf16.mxu1 %v2265_v12  ;;  %859 = vmatprep.subr.bf16.mxu0 %v2268_v13  ;;  %v2328_v12 = vld [vmem:[#allocation10 + $0x28c] ss:$16 sps:$4 sm:$0xff]   ;;  %v2323_v13 = vld [vmem:[#allocation10 + $0x280] ss:$16 sps:$4 sm:$0xff]  }
 0x1ac   :  { %817 = vmatpush1.bf16.msra.mxu1 %v2263_v14  ;;  %860 = vmatpush1.bf16.msra.mxu0 %v2266_v15  ;;  %v2326_v14 = vld [vmem:[#allocation10 + $0x288] ss:$16 sps:$4 sm:$0xff]   ;;  %v1199_v15 = vrot.slane %v1198_v6, 4 }
 0x1ad   :  { %818 = vmatprep.subr.bf16.mxu1 %v2271_v16  ;;  %861 = vmatprep.subr.bf16.mxu0 %v2274_v17  ;;  %v1210_v16 = vrot.slane %v1209_v8, 4  ;;  %v2331_v17 = vld [vmem:[#allocation10 + $0x2a4] ss:$16 sps:$4 sm:$0xff]  }
 0x1b0   :  { %819 = vmatpush1.bf16.msra.mxu1 %v2269_v18  ;;  %862 = vmatpush1.bf16.msra.mxu0 %v2272_v20  ;;  %v2334_v18 = vld [vmem:[#allocation10 + $0x2ac] ss:$16 sps:$4 sm:$0xff]   ;;  %v2329_v20 = vld [vmem:[#allocation10 + $0x2a0] ss:$16 sps:$4 sm:$0xff]  }
 0x1b1   :  { %820 = vmatprep.subr.bf16.mxu1 %v2277_v21  ;;  %863 = vmatprep.subr.bf16.mxu0 %v2280_v22  ;;  %v2332_v21 = vld [vmem:[#allocation10 + $0x2a8] ss:$16 sps:$4 sm:$0xff]   ;;  %v1200_v22 = vadd.f32 %v1199_v15, %v1198_v6 }
 0x1b4   :  { %821 = vmatpush1.bf16.msra.mxu1 %v2275_v23  ;;  %864 = vmatpush1.bf16.msra.mxu0 %v2278_v24  ;;  %v1211_v23 = vadd.f32 %v1210_v16, %v1209_v8  ;;  %v2337_v24 = vld [vmem:[#allocation10 + $0x2c4] ss:$16 sps:$4 sm:$0xff]  }
 0x1b5   :  { %822 = vmatprep.subr.bf16.mxu1 %v2283_v25  ;;  %865 = vmatprep.subr.bf16.mxu0 %v2286_v26  ;;  %v2340_v25 = vld [vmem:[#allocation10 + $0x2cc] ss:$16 sps:$4 sm:$0xff]   ;;  %v2335_v26 = vld [vmem:[#allocation10 + $0x2c0] ss:$16 sps:$4 sm:$0xff]  }
 0x1b8   :  { %823 = vmatpush1.bf16.msra.mxu1 %v2281_v30  ;;  %866 = vmatpush1.bf16.msra.mxu0 %v2284_v31  ;;  %v2338_v30 = vld [vmem:[#allocation10 + $0x2c8] ss:$16 sps:$4 sm:$0xff]   ;;  %v1201_v31 = vrot.slane %v1200_v22, 2 }
 0x1b9   :  { %824 = vmatprep.subr.bf16.mxu1 %v2289_v33  ;;  %867 = vmatprep.subr.bf16.mxu0 %v2292_v34  ;;  %v1212_v33 = vrot.slane %v1211_v23, 2  ;;  %v2343_v34 = vld [vmem:[#allocation10 + $0x2e4] ss:$16 sps:$4 sm:$0xff]  }
 0x1bc   :  { %825 = vmatpush1.bf16.msra.mxu1 %v2287_v35  ;;  %868 = vmatpush1.bf16.msra.mxu0 %v2290_v36  ;;  %v2346_v35 = vld [vmem:[#allocation10 + $0x2ec] ss:$16 sps:$4 sm:$0xff]   ;;  %v2341_v36 = vld [vmem:[#allocation10 + $0x2e0] ss:$16 sps:$4 sm:$0xff]  }
 0x1bd   :  { %826 = vmatprep.subr.bf16.mxu1 %v2295_v38  ;;  %869 = vmatprep.subr.bf16.mxu0 %v2298_v39  ;;  %v2344_v38 = vld [vmem:[#allocation10 + $0x2e8] ss:$16 sps:$4 sm:$0xff]   ;;  %v1202_v39 = vadd.f32 %v1201_v31, %v1200_v22 }
 0x1c0   :  { %827 = vmatpush1.bf16.msra.mxu1 %v2293_v40  ;;  %870 = vmatpush1.bf16.msra.mxu0 %v2296_v45  ;;  %v1213_v40 = vadd.f32 %v1212_v33, %v1211_v23  ;;  %v1191_v45 = vld [vmem:[#allocation7] sm:$0xff] }
 0x1c1   :  { %1091 = vmatprep.subr.bf16.mxu1 %v2301_v46  ;;  %1134 = vmatprep.subr.bf16.mxu0 %v2304_v10  ;;  %v1192_v46 = vld [vmem:[#allocation7 + $0x8] sm:$0xff] }
 0x1c2   :  { %v2155_v10 = vpack.c.bf16 %v1192_v46, %v1191_v45 }
 0x1c3   :  { %845 = vmatmul.mubr.bf16.vlgmr.msra.gmra.mrb[0].mxu1 %v339_v43  ;;  %888 = vmatmul.mubr.bf16.vlgmr.msra.gmra.mrb[4].mxu0 %v339_v43  ;;  %v1193_v43 = vld [vmem:[#allocation7 + $0x10] sm:$0xff] }
 0x1c4   :  { %1092 = vmatpush1.bf16.msra.mxu1 %v2299_v47  ;;  %1135 = vmatpush1.bf16.msra.mxu0 %v2302_v11  ;;  %v1203_v47 = vrot.slane %v1202_v39, 1  ;;  %v1214_v11 = vrot.slane %v1213_v40, 1 }
 0x1c5   :  { %1093 = vmatprep.subr.bf16.mxu1 %v2307_v48  ;;  %1136 = vmatprep.subr.bf16.mxu0 %v2310_v41  ;;  %v1194_v48 = vld [vmem:[#allocation7 + $0x18] sm:$0xff] }
 0x1c6   :  { %1123 = vmatprep.mubr.bf16.mxu1 %v2539_v19  ;;  %1166 = vmatprep.mubr.bf16.mxu0 %v2539_v19  ;;  %v2317_v19 = vld [vmem:[#allocation10 + $0x260] ss:$16 sps:$4 sm:$0xff]   ;;  %v2158_v41 = vpack.c.bf16 %v1194_v48, %v1193_v43 }
 0x1c8   :  { %1094 = vmatpush1.bf16.msra.mxu1 %v2305_v55  ;;  %1137 = vmatpush1.bf16.msra.mxu0 %v2308_v56  ;;  %v1204_v55 = vadd.f32 %v1203_v47, %v1202_v39  ;;  %v1215_v56 = vadd.f32 %v1214_v11, %v1213_v40 }
 0x1c9   :  { %1095 = vmatprep.subr.bf16.mxu1 %v2313_v57  ;;  %1138 = vmatprep.subr.bf16.mxu0 %v2316_v58  ;;  %v2348_v58 = vld [vmem:[%s2917_s7 + $0x8] sm:$0xff]  }
 0x1ca   :  { %v1216_v57 = vsel %vm166_vm1, %v1204_v55, %v1215_v56 }
 0x1cc   :  { %1096 = vmatpush1.bf16.msra.mxu1 %v2311_v59  ;;  %1139 = vmatpush1.bf16.msra.mxu0 %v2314_v60 }
 0x1cd   :  { %1097 = vmatprep.subr.bf16.mxu1 %v2319_v61  ;;  %1140 = vmatprep.subr.bf16.mxu0 %v2322_v62 }
 0x1d0   :  { %1098 = vmatpush1.bf16.msra.mxu1 %v2317_v19  ;;  %1141 = vmatpush1.bf16.msra.mxu0 %v2320_v5 }
 0x1d1   :  { %1099 = vmatprep.subr.bf16.mxu1 %v2325_v9  ;;  %1142 = vmatprep.subr.bf16.mxu0 %v2328_v12 }
 0x1d4   :  { %1100 = vmatpush1.bf16.msra.mxu1 %v2323_v13  ;;  %1143 = vmatpush1.bf16.msra.mxu0 %v2326_v14 }
 0x1d5   :  { %1101 = vmatprep.subr.bf16.mxu1 %v2331_v17  ;;  %1144 = vmatprep.subr.bf16.mxu0 %v2334_v18  ;;  %v1303_v17 = vrot.slane %v2712_v28, 1 }
 0x1d8   :  { %1102 = vmatpush1.bf16.msra.mxu1 %v2329_v20  ;;  %1145 = vmatpush1.bf16.msra.mxu0 %v2332_v21  ;;  %v1314_v20 = vsub.s32 3, %v2707_v27 }
 0x1d9   :  { %1103 = vmatprep.subr.bf16.mxu1 %v2337_v24  ;;  %1146 = vmatprep.subr.bf16.mxu0 %v2340_v25 }
 0x1dc   :  { %1104 = vmatpush1.bf16.msra.mxu1 %v2335_v26  ;;  %1147 = vmatpush1.bf16.msra.mxu0 %v2338_v30  ;;  %v1315_v26 = vrot.slane %v2712_v28, %v1314_v20 }
 0x1dd   :  { %1105 = vmatprep.subr.bf16.mxu1 %v2343_v34  ;;  %1148 = vmatprep.subr.bf16.mxu0 %v2346_v35 }
 0x1e0   :  { %1106 = vmatpush1.bf16.msra.mxu1 %v2341_v36  ;;  %1149 = vmatpush1.bf16.msra.mxu0 %v2344_v38 }
 0x1e1   :  { %2154 = vmatprep.subr.bf16.mxu1 %v2536_v0  ;;  %2160 = vmatprep.subr.bf16.mxu0 %v2536_v0 }
 0x1e3   :  { %1124 = vmatmul.mubr.bf16.vlgmr.msra.gmra.mrb[0].mxu1 %v2767_v7  ;;  %1167 = vmatmul.mubr.bf16.vlgmr.msra.gmra.mrb[4].mxu0 %v2767_v7  ;;  %v2347_v7 = vld [vmem:[%s2917_s7] sm:$0xff]  }
 0x1e4   :  { %2156 = vmatpush3.bf16.msra.mxu1 %v2155_v10  ;;  %2072 = vmatprep.mubr.msk.f32.mxu1 %vm2537_vm0, %v2538_v1 }
 0x1e5   :  { %2157 = vmatprep.subr.bf16.mxu1 %v2536_v0  ;;  %2115 = vmatprep.mubr.msk.f32.mxu0 %vm2537_vm0, %v2538_v1 }
 0x1e8   :  { %2159 = vmatpush3.bf16.msra.mxu1 %v2158_v41 }
 0x1e9   :  { %2075 = vmatprep.subr.bf16.mxu1 %v2538_v1 }
 0x1eb   :  { %2073 = vmatmul.mubr.msk.f32.vlgmr.msra.gmra.mrb[4].mxu1 %vm1195_vm9, %v1216_v57 }
 0x1ec   :  { %2079 = vmatprep.mubr.msk.bf16.mxu1 %vm2537_vm0, %v2538_v1  ;;  %2076 = vmatpush3.bf16.msra.mxu1 %v2347_v7 }
 0x1ed   :  { %2077 = vmatprep.subr.bf16.mxu1 %v2538_v1 }
 0x1f0   :  { %2078 = vmatpush3.bf16.msra.mxu1 %v2348_v58 }
 0x1f1   :  { %2083 = vmatprep.subr.bf16.mxu1 %v2538_v1 }
 0x2b6   :  { %v1125_v44 = vpop.f32.mrb[0].mxu1  ;;  %v1168_v49 = vpop.f32.mrb[4].mxu0 }
 0x2b7   :  { %v1127_v59 = vpop.f32.mrb[1].mxu1  ;;  %v1170_v60 = vpop.f32.mrb[5].mxu0 }
 0x2b8   :  { %v1185_v61 = vmax.f32 %v1125_v44, %v1127_v59  ;;  %v1187_v62 = vmax.f32 %v1168_v49, %v1170_v60  ;;  %v1129_v63 = vpop.f32.mrb[2].mxu1  ;;  %v1172_v2 = vpop.f32.mrb[6].mxu0 }
 0x2b9   :  { %v1131_v3 = vpop.f32.mrb[3].mxu1  ;;  %v1174_v4 = vpop.f32.mrb[7].mxu0 }
 0x2ba   :  { %v2811_v19 = vmax.f32 %v1185_v61, %v1187_v62  ;;  %v1186_v5 = vmax.f32 %v1129_v63, %v1131_v3  ;;  %v1188_v6 = vmax.f32 %v1172_v2, %v1174_v4 }
 0x2bc   :  { %v2813_v8 = vmax.f32 %v1186_v5, %v1188_v6 }
 0x2be   :  { %v1286_v9 = vpop.f32.mrb[4].mxu1 }
 0x2bf   :  { %v1290_v12 = vmul.f32 %v1286_v9, %v1286_v9  ;;  %v2074_v13 = vpop.f32.mrb[5].mxu1  ;;  %v1300_v18 = vrot.slane %v1286_v9, %v2715_v29 }
 0x2c1   :  { %v1292_v14 = vrot.slane %v1290_v12, 7  ;;  %v1301_v23 = vsub.f32 %v2773_v52, %v1300_v18  ;;  %v1302_v24 = vsub.f32 %v2775_v42, %v1300_v18 }
 0x2c3   :  { %v1294_v15 = vsub.f32 %v1286_v9, %v1292_v14 }
 0x2c5   :  { %v1295_v16 = vadd.f32 1e-05, %v1294_v15 }
 0x2c7   :  { %2367 = vrsqrt.f32 %v1295_v16 }
 0x2d1   :  { %v2368_v21 = vpop.eup %2367 }
 0x2d2   :  { %v1305_v22 = vmul.f32 %v2368_v21, %v1303_v17 }
 0x2d4   :  { %v1309_v25 = vrot.slane %v1305_v22, %v2720_v32 }
 0x2d6   :  { %v1310_v30 = vmul.f32 %v1309_v25, %v1301_v23  ;;  %v1311_v31 = vmul.f32 %v1309_v25, %v1302_v24 }
 0x2d8   :  { %v1316_v33 = vadd.f32 %v1315_v26, %v1310_v30  ;;  %v1317_v34 = vadd.f32 %v1315_v26, %v1311_v31 }
 0x2da   :  { %v1320_v35 = vmul.f32 0.70710677, %v1316_v33  ;;  %v1321_v36 = vmul.f32 0.70710677, %v1317_v34  ;;  %v1318_v26 = vmul.f32 0.5, %v1316_v33  ;;  %v1319_v31 = vmul.f32 0.5, %v1317_v34 }
 0x2db   :  { %v2350_v34 = vld [vmem:[%s2917_s7 + $0x18] sm:$0xff]  }
 0x2dc   :  { %v1326_v38 = vand.u32 2147483647, %v1320_v35  ;;  %v1327_v39 = vand.u32 2147483647, %v1321_v36  ;;  %vm1322_vm10 = vcmp.ge.f32.partialorder %v1320_v35, 0.0  ;;  %vm1323_vm11 = vcmp.ge.f32.partialorder %v1321_v36, 0.0 }
 0x2dd   :  { %v1324_v21 = vsel %vm1322_vm10, 1.0, %v2540_v37  ;;  %v1325_v23 = vsel %vm1323_vm11, 1.0, %v2540_v37 }
 0x2de   :  { %v1328_v40 = vmul.f32 0.3275911, %v1326_v38  ;;  %v1329_v45 = vmul.f32 0.3275911, %v1327_v39  ;;  %v1352_v47 = vsub.f32 0.0, %v1326_v38  ;;  %v1353_v11 = vsub.f32 0.0, %v1327_v39 }
 0x2e0   :  { %v1330_v46 = vadd.f32 1.0, %v1328_v40  ;;  %v1331_v10 = vadd.f32 1.0, %v1329_v45  ;;  %v1354_v48 = vmul.f32 %v1352_v47, %v1326_v38  ;;  %v1355_v56 = vmul.f32 %v1353_v11, %v1327_v39  ;;  %v2349_v11 = vld [vmem:[%s2917_s7 + $0x10] sm:$0xff]  }
 0x2e2   :  { %2369 = vrcp.f32 %v1330_v46  ;;  %v1356_v44 = vmul.f32 1.442695, %v1354_v48  ;;  %v1358_v59 = vmul.f32 1.442695, %v1355_v56  ;;  %v2352_v56 = vld [vmem:[%s2917_s7 + $0x28] sm:$0xff]  }
 0x2e3   :  { %2371 = vrcp.f32 %v1331_v10 }
 0x2e4   :  { %2373 = vpow2.f32 %v1356_v44  ;;  %v1577_v44 = vld [vmem:[#allocation8] sm:$0xff] }
 0x2e5   :  { %2375 = vpow2.f32 %v1358_v59 }
 0x2ec   :  { %v2370_v43 = vpop.eup %2369 }
 0x2ed   :  { %v2372_v41 = vpop.eup %2371  ;;  %v1334_v55 = vmul.f32 1.0614054, %v2370_v43 }
 0x2ee   :  { %v1335_v57 = vmul.f32 1.0614054, %v2372_v41  ;;  %v2374_v14 = vpop.eup %2373 }
 0x2ef   :  { %v1336_v7 = vadd.f32 -1.4531521, %v1334_v55  ;;  %v2376_v16 = vpop.eup %2375 }
 0x2f0   :  { %v1337_v58 = vadd.f32 -1.4531521, %v1335_v57 }
 0x2f1   :  { %v1338_v49 = vmul.f32 %v2370_v43, %v1336_v7 }
 0x2f2   :  { %v1339_v60 = vmul.f32 %v2372_v41, %v1337_v58 }
 0x2f3   :  { %v1340_v61 = vadd.f32 1.4214138, %v1338_v49  ;;  %v1578_v49 = vld [vmem:[#allocation8 + $0x8] sm:$0xff] }
 0x2f4   :  { %v1341_v62 = vadd.f32 1.4214138, %v1339_v60  ;;  %v2161_v59 = vpack.c.bf16 %v1578_v49, %v1577_v44  ;;  %v1579_v60 = vld [vmem:[#allocation8 + $0x10] sm:$0xff] }
 0x2f5   :  { %v1342_v63 = vmul.f32 %v2370_v43, %v1340_v61  ;;  %v1580_v61 = vld [vmem:[#allocation8 + $0x18] sm:$0xff] }
 0x2f6   :  { %v1343_v2 = vmul.f32 %v2372_v41, %v1341_v62  ;;  %2162 = vmatpush3.bf16.msra.mxu0 %v2161_v59  ;;  %v1582_v62 = vld [vmem:[#allocation8 + $0x28] sm:$0xff] }
 0x2f7   :  { %v1344_v3 = vadd.f32 -0.28449672, %v1342_v63  ;;  %2163 = vmatprep.subr.bf16.mxu0 %v2536_v0 }
 0x2f8   :  { %v1345_v4 = vadd.f32 -0.28449672, %v1343_v2  ;;  %v1583_v2 = vld [vmem:[#allocation8 + $0x30] sm:$0xff] }
 0x2f9   :  { %v1346_v5 = vmul.f32 %v2370_v43, %v1344_v3  ;;  %v1584_v3 = vld [vmem:[#allocation8 + $0x38] sm:$0xff] }
 0x2fa   :  { %v1347_v6 = vmul.f32 %v2372_v41, %v1345_v4  ;;  %v2170_v4 = vpack.c.bf16 %v1584_v3, %v1583_v2 }
 0x2fb   :  { %v1348_v9 = vadd.f32 0.2548296, %v1346_v5 }
 0x2fc   :  { %v1349_v12 = vadd.f32 0.2548296, %v1347_v6 }
 0x2fd   :  { %v1350_v13 = vmul.f32 %v2370_v43, %v1348_v9 }
 0x2fe   :  { %v1351_v15 = vmul.f32 %v2372_v41, %v1349_v12 }
 0x2ff   :  { %v1360_v17 = vmul.f32 %v2374_v14, %v1350_v13 }
 0x300   :  { %v1361_v18 = vmul.f32 %v2376_v16, %v1351_v15 }
 0x301   :  { %v1362_v20 = vsub.f32 1.0, %v1360_v17 }
 0x302   :  { %v1363_v22 = vsub.f32 1.0, %v1361_v18 }
 0x303   :  { %v1364_v24 = vmul.f32 %v1362_v20, %v1324_v21 }
 0x304   :  { %v1365_v25 = vmul.f32 %v1363_v22, %v1325_v23 }
 0x305   :  { %v1366_v30 = vadd.f32 1.0, %v1364_v24 }
 0x306   :  { %v1367_v38 = vadd.f32 1.0, %v1365_v25 }
 0x307   :  { %v1368_v39 = vmul.f32 %v1366_v30, %v1318_v26 }
 0x308   :  { %v1369_v40 = vmul.f32 %v1367_v38, %v1319_v31 }
 0x309   :  { %v1372_v45 = vrot.slane %v1368_v39, 7 }
 0x30a   :  { %v1373_v46 = vrot.slane %v1369_v40, 7  ;;  %v1381_v43 = vrot.slane %v1369_v40, 1  ;;  %v1389_v48 = vpack.c.bf16 %v1369_v40, %v1368_v39 }
 0x30b   :  { %v1377_v35 = vsel %vm166_vm1, 0.0, %v1372_v45 }
 0x30c   :  { %v1374_v36 = vsel %vm166_vm1, %v1372_v45, %v1373_v46  ;;  %v1378_v10 = vmul.f32 %v2744_v50, %v1377_v35  ;;  %v1380_v50 = vrot.slane %v1368_v39, 1  ;;  %v1385_v55 = vsel %vm329_vm8, %v1381_v43, 0.0 }
 0x30d   :  { %v1379_v47 = vmul.f32 %v2747_v51, %v1374_v36  ;;  %v2351_v51 = vld [vmem:[%s2917_s7 + $0x20] sm:$0xff]   ;;  %v1387_v7 = vmul.f32 %v2756_v54, %v1385_v55  ;;  %v1581_v54 = vld [vmem:[#allocation8 + $0x20] sm:$0xff] }
 0x30e   :  { %v1382_v41 = vsel %vm329_vm8, %v1380_v50, %v1381_v43  ;;  %v2167_v63 = vpack.c.bf16 %v1582_v62, %v1581_v54  ;;  %v2353_v55 = vld [vmem:[%s2918_s8] sm:$0xff]   ;;  %v1704_v62 = vsub.s32 5, %v2707_v27 }
 0x30f   :  { %v1388_v33 = vpack.c.bf16 %v1379_v47, %v1378_v10  ;;  %v1386_v57 = vmul.f32 %v2753_v53, %v1382_v41  ;;  %v2164_v53 = vpack.c.bf16 %v1580_v61, %v1579_v60 }
 0x311   :  { %2080 = vmatmul.mubr.msk.bf16.vlgmr.msra.gmra.mrb[8].mxu1 %vm1195_vm9, %v1388_v33  ;;  %v1390_v58 = vpack.c.bf16 %v1387_v7, %v1386_v57  ;;  %2165 = vmatpush3.bf16.msra.mxu0 %v2164_v53  ;;  %v2355_v57 = vld [vmem:[%s2918_s8 + $0x10] sm:$0xff]   ;;  %v2356_v7 = vld [vmem:[%s2918_s8 + $0x18] sm:$0xff]   ;;  %v1693_v53 = vrot.slane %v2712_v28, 3 }
 0x312   :  { %2084 = vmatpush3.bf16.msra.mxu1 %v2349_v11  ;;  %2087 = vmatprep.mubr.msk.bf16.mxu1 %vm2537_vm0, %v2538_v1 }
 0x313   :  { %2085 = vmatprep.subr.bf16.mxu1 %v2538_v1  ;;  %2166 = vmatprep.subr.bf16.mxu0 %v2536_v0 }
 0x315   :  { %2168 = vmatpush3.bf16.msra.mxu0 %v2167_v63 }
 0x316   :  { %2086 = vmatpush3.bf16.msra.mxu1 %v2350_v34  ;;  %2169 = vmatprep.subr.bf16.mxu0 %v2536_v0 }
 0x317   :  { %2091 = vmatprep.subr.bf16.mxu1 %v2538_v1 }
 0x319   :  { %2088 = vmatmul.mubr.msk.bf16.vlgmr.msra.gmra.mrb[12].mxu1 %vm1195_vm9, %v1389_v48  ;;  %2171 = vmatpush3.bf16.msra.mxu0 %v2170_v4 }
 0x31a   :  { %2092 = vmatpush3.bf16.msra.mxu1 %v2351_v51  ;;  %2095 = vmatprep.mubr.msk.bf16.mxu1 %vm2537_vm0, %v2538_v1 }
 0x31b   :  { %2093 = vmatprep.subr.bf16.mxu1 %v2538_v1 }
 0x31e   :  { %2094 = vmatpush3.bf16.msra.mxu1 %v2352_v56  ;;  %v2354_v56 = vld [vmem:[%s2918_s8 + $0x8] sm:$0xff]   ;;  %s2541_s8 = smov [#allocation11]  }
 0x31f   :  { %2118 = vmatprep.subr.bf16.mxu1 %v2538_v1  ;;  %s1846_s28 = sshll.u32 %s2541_s8, 4  ;;  %s1847_s28 = int_to_ptr.vmem [resolvable:$true] %s1846_s28 }
 0x320   :  { %s2497_s6 = scalar_lea.vmem %s1847_s28, 256  ;;  %p2502_p13 = scmp.lt.s32.totalorder %s1847_s28, %s1847_s28 }
 0x321   :  { %2096 = vmatmul.mubr.msk.bf16.vlgmr.msra.gmra.mrb[16].mxu1 %vm1195_vm9, %v1390_v58  ;;  %p2498_p12 = scmp.ne.s32.totalorder %s1847_s28, %s2497_s6  ;;  %p2503_p0 = scmp.lt.s32.totalorder %s2497_s6, %s2497_s6 }
 0x322   :  { %2126 = vmatprep.mubr.msk.bf16.mxu1 %vm2537_vm0, %v2538_v1  ;;  %2119 = vmatpush3.bf16.msra.mxu1 %v2353_v55 }
 0x323   :  { %2120 = vmatprep.subr.bf16.mxu1 %v2538_v1  ;;  %p2504_p1 = por %p2503_p0, %p2502_p13 }
 0x325   :  { %p2505_p2 = pnand %p2504_p1, %p2498_p12 }
 0x326   :  { %2121 = vmatpush3.bf16.msra.mxu1 %v2354_v56 }
 0x327   :  { %2122 = vmatprep.subr.bf16.mxu1 %v2538_v1 }
 0x32a   :  { %2123 = vmatpush3.bf16.msra.mxu1 %v2355_v57 }
 0x32b   :  { %2124 = vmatprep.subr.bf16.mxu1 %v2538_v1 }
 0x32e   :  { %2125 = vmatpush3.bf16.msra.mxu1 %v2356_v7 }
 0x3e4   :  { %v1449_v5 = vpop.f32.mrb[8].mxu1 }
 0x3e5   :  { %v2081_v6 = vpop.f32.mrb[9].mxu1 }
 0x3e6   :  { %v1452_v9 = vpop.f32.mrb[10].mxu1 }
 0x3e7   :  { %v2082_v12 = vpop.f32.mrb[11].mxu1 }
 0x3ec   :  { %v1505_v13 = vpop.f32.mrb[12].mxu1 }
 0x3ed   :  { %v1506_v14 = vadd.f32 %v1505_v13, %v1449_v5  ;;  %v2089_v15 = vpop.f32.mrb[13].mxu1  ;;  %v1705_v5 = vrot.slane %v2712_v28, %v1704_v62 }
 0x3ee   :  { %v1508_v16 = vpop.f32.mrb[14].mxu1 }
 0x3ef   :  { %v1509_v17 = vadd.f32 %v1508_v16, %v1452_v9  ;;  %v2090_v18 = vpop.f32.mrb[15].mxu1 }
 0x3f4   :  { %v1566_v20 = vpop.f32.mrb[16].mxu1 }
 0x3f5   :  { %v1573_v21 = vadd.f32 %v1566_v20, %v1506_v14  ;;  %v2097_v22 = vpop.f32.mrb[17].mxu1 }
 0x3f6   :  { %v1569_v23 = vpop.f32.mrb[18].mxu1 }
 0x3f7   :  { %v1575_v24 = vadd.f32 %v1573_v21, %v2811_v19  ;;  %v1574_v25 = vadd.f32 %v1569_v23, %v1509_v17  ;;  %v2098_v26 = vpop.f32.mrb[19].mxu1 }
 0x3f9   :  { %v1595_v0 = vmul.f32 %v1575_v24, %v1575_v24  ;;  %v1576_v30 = vadd.f32 %v1574_v25, %v2813_v8  ;;  %v1586_v31 = vsel %vm1585_vm12, %v1575_v24, 0.0 }
 0x3fb   :  { %v1587_v38 = vsel %vm1585_vm12, %v1576_v30, 0.0  ;;  %v1596_v39 = vmul.f32 %v1576_v30, %v1576_v30  ;;  %v1597_v45 = vsel %vm1585_vm12, %v1595_v0, 0.0 }
 0x3fc   :  { %v1588_v40 = vadd.f32 %v1587_v38, %v1586_v31 }
 0x3fd   :  { %v1598_v46 = vsel %vm1585_vm12, %v1596_v39, 0.0 }
 0x3fe   :  { %v1589_v35 = vrot.slane %v1588_v40, 4  ;;  %v1599_v36 = vadd.f32 %v1598_v46, %v1597_v45 }
 0x400   :  { %v1590_v10 = vadd.f32 %v1589_v35, %v1588_v40  ;;  %v1600_v19 = vrot.slane %v1599_v36, 4 }
 0x402   :  { %v1591_v47 = vrot.slane %v1590_v10, 2  ;;  %v1601_v11 = vadd.f32 %v1600_v19, %v1599_v36 }
 0x404   :  { %v1592_v33 = vadd.f32 %v1591_v47, %v1590_v10  ;;  %v1602_v34 = vrot.slane %v1601_v11, 2 }
 0x406   :  { %v1593_v50 = vrot.slane %v1592_v33, 1  ;;  %v1603_v8 = vadd.f32 %v1602_v34, %v1601_v11 }
 0x408   :  { %v1604_v43 = vrot.slane %v1603_v8, 1  ;;  %v1594_v51 = vadd.f32 %v1593_v50, %v1592_v33 }
 0x40a   :  { %v1605_v48 = vadd.f32 %v1604_v43, %v1603_v8 }
 0x40c   :  { %v1606_v41 = vsel %vm166_vm1, %v1594_v51, %v1605_v48 }
 0x40d   :  { %2116 = vmatmul.mubr.msk.f32.vlgmr.msra.gmra.mrb[2].mxu0 %vm1585_vm12, %v1606_v41 }
 0x4e0   :  { %v1676_v58 = vpop.f32.mrb[2].mxu0 }
 0x4e1   :  { %v1680_v44 = vmul.f32 %v1676_v58, %v1676_v58  ;;  %v2117_v49 = vpop.f32.mrb[3].mxu0  ;;  %v1690_v54 = vrot.slane %v1676_v58, %v2715_v29 }
 0x4e3   :  { %v1682_v59 = vrot.slane %v1680_v44, 7  ;;  %v1691_v2 = vsub.f32 %v1575_v24, %v1690_v54  ;;  %v1692_v3 = vsub.f32 %v1576_v30, %v1690_v54 }
 0x4e5   :  { %v1684_v60 = vsub.f32 %v1676_v58, %v1682_v59 }
 0x4e7   :  { %v1685_v61 = vadd.f32 1e-05, %v1684_v60 }
 0x4e9   :  { %2377 = vrsqrt.f32 %v1685_v61 }
 0x4f3   :  { %v2378_v63 = vpop.eup %2377 }
 0x4f4   :  { %v1695_v1 = vmul.f32 %v2378_v63, %v1693_v53 }
 0x4f6   :  { %v1699_v4 = vrot.slane %v1695_v1, %v2720_v32 }
 0x4f8   :  { %v1700_v6 = vmul.f32 %v1699_v4, %v1691_v2  ;;  %v1701_v9 = vmul.f32 %v1699_v4, %v1692_v3 }
 0x4fa   :  { %v1706_v12 = vadd.f32 %v1705_v5, %v1700_v6  ;;  %v1707_v13 = vadd.f32 %v1705_v5, %v1701_v9 }
 0x4fc   :  { %v1710_v14 = vmul.f32 0.70710677, %v1706_v12  ;;  %v1711_v15 = vmul.f32 0.70710677, %v1707_v13  ;;  %v1708_v49 = vmul.f32 0.5, %v1706_v12  ;;  %v1709_v60 = vmul.f32 0.5, %v1707_v13 }
 0x4fe   :  { %v1716_v16 = vand.u32 2147483647, %v1710_v14  ;;  %v1717_v17 = vand.u32 2147483647, %v1711_v15  ;;  %vm1712_vm13 = vcmp.ge.f32.partialorder %v1710_v14, 0.0  ;;  %vm1713_vm14 = vcmp.ge.f32.partialorder %v1711_v15, 0.0 }
 0x4ff   :  { %v1714_v56 = vsel %vm1712_vm13, 1.0, %v2540_v37  ;;  %v1715_v7 = vsel %vm1713_vm14, 1.0, %v2540_v37 }
 0x500   :  { %v1718_v18 = vmul.f32 0.3275911, %v1716_v16  ;;  %v1719_v29 = vmul.f32 0.3275911, %v1717_v17  ;;  %v1742_v21 = vsub.f32 0.0, %v1716_v16  ;;  %v1743_v22 = vsub.f32 0.0, %v1717_v17 }
 0x502   :  { %v1720_v20 = vadd.f32 1.0, %v1718_v18  ;;  %v1721_v27 = vadd.f32 1.0, %v1719_v29  ;;  %v1744_v32 = vmul.f32 %v1742_v21, %v1716_v16  ;;  %v1745_v25 = vmul.f32 %v1743_v22, %v1717_v17 }
 0x504   :  { %2379 = vrcp.f32 %v1720_v20  ;;  %v1746_v31 = vmul.f32 1.442695, %v1744_v32  ;;  %v1748_v39 = vmul.f32 1.442695, %v1745_v25 }
 0x505   :  { %2381 = vrcp.f32 %v1721_v27 }
 0x506   :  { %2383 = vpow2.f32 %v1746_v31 }
 0x507   :  { %2385 = vpow2.f32 %v1748_v39 }
 0x50e   :  { %v2380_v23 = vpop.eup %2379 }
 0x50f   :  { %v2382_v24 = vpop.eup %2381  ;;  %v1724_v28 = vmul.f32 1.0614054, %v2380_v23 }
 0x510   :  { %v1725_v26 = vmul.f32 1.0614054, %v2382_v24  ;;  %v2384_v8 = vpop.eup %2383 }
 0x511   :  { %v1726_v0 = vadd.f32 -1.4531521, %v1724_v28  ;;  %v2386_v51 = vpop.eup %2385 }
 0x512   :  { %v1727_v30 = vadd.f32 -1.4531521, %v1725_v26 }
 0x513   :  { %v1728_v38 = vmul.f32 %v2380_v23, %v1726_v0 }
 0x514   :  { %v1729_v40 = vmul.f32 %v2382_v24, %v1727_v30 }
 0x515   :  { %v1730_v45 = vadd.f32 1.4214138, %v1728_v38 }
 0x516   :  { %v1731_v46 = vadd.f32 1.4214138, %v1729_v40 }
 0x517   :  { %v1732_v35 = vmul.f32 %v2380_v23, %v1730_v45 }
 0x518   :  { %v1733_v36 = vmul.f32 %v2382_v24, %v1731_v46 }
 0x519   :  { %v1734_v10 = vadd.f32 -0.28449672, %v1732_v35 }
 0x51a   :  { %v1735_v19 = vadd.f32 -0.28449672, %v1733_v36 }
 0x51b   :  { %v1736_v47 = vmul.f32 %v2380_v23, %v1734_v10 }
 0x51c   :  { %v1737_v11 = vmul.f32 %v2382_v24, %v1735_v19 }
 0x51d   :  { %v1738_v33 = vadd.f32 0.2548296, %v1736_v47 }
 0x51e   :  { %v1739_v34 = vadd.f32 0.2548296, %v1737_v11 }
 0x51f   :  { %v1740_v50 = vmul.f32 %v2380_v23, %v1738_v33 }
 0x520   :  { %v1741_v43 = vmul.f32 %v2382_v24, %v1739_v34 }
 0x521   :  { %v1750_v48 = vmul.f32 %v2384_v8, %v1740_v50 }
 0x522   :  { %v1751_v41 = vmul.f32 %v2386_v51, %v1741_v43 }
 0x523   :  { %v1752_v55 = vsub.f32 1.0, %v1750_v48 }
 0x524   :  { %v1753_v57 = vsub.f32 1.0, %v1751_v41 }
 0x525   :  { %v1754_v58 = vmul.f32 %v1752_v55, %v1714_v56 }
 0x526   :  { %v1755_v44 = vmul.f32 %v1753_v57, %v1715_v7 }
 0x527   :  { %v1756_v59 = vadd.f32 1.0, %v1754_v58 }
 0x528   :  { %v1757_v61 = vadd.f32 1.0, %v1755_v44 }
 0x529   :  { %v1758_v53 = vmul.f32 %v1756_v59, %v1708_v49 }
 0x52a   :  { %v1759_v54 = vmul.f32 %v1757_v61, %v1709_v60 }
 0x52c   :  { %v1760_v62 = vpack.c.bf16 %v1759_v54, %v1758_v53 }
 0x52e   :  { %2127 = vmatmul.mubr.msk.bf16.vlgmr.msra.gmra.mrb[20].mxu1 %vm1585_vm12, %v1760_v62 }
 0x601   :  { %v1830_v63 = vpop.f32.mrb[20].mxu1 }
 0x602   :  { %v1831_v1 = vadd.f32 0.009512655, %v1830_v63  ;;  %v2128_v2 = vpop.f32.mrb[21].mxu1 }
 0x603   :  { %v1833_v3 = vpop.f32.mrb[22].mxu1 }
 0x604   :  { %v1837_v4 = vmul.f32 %v1831_v1, %v2773_v52  ;;  %v1834_v37 = vadd.f32 0.009512655, %v1833_v3  ;;  %v2129_v5 = vpop.f32.mrb[23].mxu1 }
 0x606   :  { %1839 = vst.msk [vmem:[#allocation11] sm:$0xff] %vm1195_vm9, %v1837_v4  ;;  %v1838_v6 = vmul.f32 %v1834_v37, %v2775_v42 }
 0x608   :  { %1840 = vst.msk [vmem:[#allocation11 + $0x8] sm:$0xff] %vm1195_vm9, %v1838_v6 }
 0x609   :  { %2508 = shalt.err (!%p2505_p2)
}
 0x60a   :  { %s2509_s11 = scalar_lea.hbm %s2919_s9, 256 }
 0x60b   :  { %p2510_p3 = scmp.ne.s32.totalorder %s2919_s9, %s2509_s11  ;;  %p2513_p4 = scmp.lt.u32.totalorder %s2509_s11, %s2919_s9 }
 0x60d   :  { %p2515_p5 = pnand %p2513_p4, %p2510_p3 }
 0x60f   :  { %2518 = shalt.err (!%p2515_p5)
}
 0x610   :  { %1852 = dma.vmem_to_hbm [thread:$0]  %s1847_s28, 256, %s2919_s9, [#allocation4], %s2529_s21, %s2529_s21, %s2530_s22  }
 0x611   :  { %2525 = dma.done.wait [#allocation4], 256  }
 0x612   :  { %2526 = vsyncadd [#allocation4], 4294967040 }
 0x613   :  { %1856 = vsyncpa [#allocation3], 1 }
 0x614   :  { %1857 = vsyncpa [#allocation6], 1 }
 0x615   :  { %1858 = vsyncpa [#allocation9], 1 }
 0x616   :  { %1859 = vsyncpa [#allocation4], 1 }

</bundles_post_ra>
